<compile_context>
chip_gen: v7x
topology: tpu7x:2x2x1
jax: 0.10.0
libtpu: 0.0.40
codegen_flags: <defaults>
</compile_context>

<pallas_src>
import functools

import jax
import jax.numpy as jnp
from jax.experimental import pallas as pl
from jax.experimental.pallas import tpu as pltpu


# ----------------------------------------------------------------------------
# Fused S_recon forward kernel (one batch image per grid step)
# ----------------------------------------------------------------------------
def _s_recon_kernel(x_ref, w_ref, b_ref, o_ref, a_ref, *, H, n_blocks):
    """
    x_ref : (1, H, W*Cp)        input image, channel-minor lanes (lane-dense)
    w_ref : (L, 3, W*Cp, W*Cp)  per-layer, per-kh banded conv matrices (kw + W-pad folded in)
    b_ref : (L, 1, W*Cp)        per-layer bias, tiled along w
    o_ref : (1, H, W*Cp)        output image
    a_ref : (H+2, W*Cp) scratch zero-haloed (H direction) activation staging buffer
    """
    # Zero once; rows 0 and H+1 are the H-direction zero halo and are never overwritten
    # (stage() only writes rows 1..H).
    a_ref[...] = jnp.zeros_like(a_ref)

    def stage(act):
        a_ref[1:1 + H, :] = act

    def conv(layer):
        # 3x3 'same' conv == sum over kh of (row-shifted activation) @ banded weight.
        acc = jnp.dot(a_ref[0:H, :], w_ref[layer, 0],
                      preferred_element_type=jnp.float32)
        acc = acc + jnp.dot(a_ref[1:1 + H, :], w_ref[layer, 1],
                            preferred_element_type=jnp.float32)
        acc = acc + jnp.dot(a_ref[2:2 + H, :], w_ref[layer, 2],
                            preferred_element_type=jnp.float32)
        return acc + b_ref[layer]

    # conv_in + ReLU
    stage(x_ref[0])
    h = jnp.maximum(conv(0), 0.0)

    # residual blocks (conv-ReLU-conv + skip); everything stays in VMEM, residual add fused
    layer = 1
    for _ in range(n_blocks):
        stage(h)
        y = jnp.maximum(conv(layer), 0.0)
        stage(y)
        h = h + conv(layer + 1)
        layer += 2

    # conv_out + tanh
    stage(h)
    o_ref[0] = jnp.tanh(conv(layer)).astype(o_ref.dtype)


# ----------------------------------------------------------------------------
# Parameter init (matches the previous version's conv stack semantics)
# ----------------------------------------------------------------------------
def init_s_recon_params(key, in_ch=3, hidden=8, n_blocks=2, out_ch=3):
    def conv_init(k, cin, cout):
        k1, k2 = jax.random.split(k)
        scale = 1.0 / jnp.sqrt(3.0 * 3.0 * cin)
        w = jax.random.uniform(k1, (3, 3, cin, cout), jnp.float32, -scale, scale)
        b = jax.random.uniform(k2, (cout,), jnp.float32, -scale, scale)
        return w, b

    keys = jax.random.split(key, 2 + 2 * n_blocks)
    return {
        "in": conv_init(keys[0], in_ch, hidden),
        "blocks": [
            (conv_init(keys[1 + 2 * i], hidden, hidden),
             conv_init(keys[2 + 2 * i], hidden, hidden))
            for i in range(n_blocks)
        ],
        "out": conv_init(keys[-1], hidden, out_ch),
    }


# ----------------------------------------------------------------------------
# Pack: fold kw taps + W-direction zero padding into banded (W*Cp, W*Cp) matrices
# ----------------------------------------------------------------------------
def pack_s_recon_params(params, W):
    layer_list = [params["in"]]
    for c1, c2 in params["blocks"]:
        layer_list += [c1, c2]
    layer_list.append(params["out"])

    max_ch = max(max(w.shape[2], w.shape[3]) for w, _ in layer_list)
    Cp = max(8, -(-max_ch // 8) * 8)                       # pad channels to sublane multiple
    # S_kw[w_src, w_dst] = 1  iff  w_src == w_dst + (kw - 1)   (zero pad at W edges)
    eyes = [jnp.eye(W, k=1 - kw, dtype=jnp.float32) for kw in range(3)]

    Ws, Bs = [], []
    for w, b in layer_list:
        cin, cout = w.shape[2], w.shape[3]
        wp = jnp.zeros((3, 3, Cp, Cp), jnp.float32).at[:, :, :cin, :cout].set(w)
        bp = jnp.zeros((Cp,), jnp.float32).at[:cout].set(b)
        # M_kh[(w_src*Cp + ci), (w_dst*Cp + co)] = weight[kh, kw, ci, co] with w_src = w_dst+kw-1
        mats = [sum(jnp.kron(eyes[kw], wp[kh, kw]) for kw in range(3))
                for kh in range(3)]
        Ws.append(jnp.stack(mats))                         # (3, W*Cp, W*Cp)
        Bs.append(jnp.tile(bp, W)[None, :])                # (1, W*Cp)

    return {
        "w": jnp.stack(Ws),                                # (L, 3, W*Cp, W*Cp)
        "b": jnp.stack(Bs),                                # (L, 1, W*Cp)
        "Cp": Cp,
        "n_blocks": len(params["blocks"]),
        "out_ch": layer_list[-1][0].shape[3],
    }


# ----------------------------------------------------------------------------
# Forward wrapper: NCHW in/out, single fused pallas_call inside
# ----------------------------------------------------------------------------
def s_recon_forward(packed, syn_img_nchw):
    """Equivalent of `self.s_recon_img = self.S_recon(syn_img)[-1]` (eval path)."""
    N, Cin, H, W = syn_img_nchw.shape
    Cp = packed["Cp"]
    L = packed["w"].shape[0]
    WC = W * Cp

    # NCHW -> (N, H, W*Cp), channel-minor along the lane axis (WC == 128 here: lane-dense).
    x = jnp.transpose(syn_img_nchw, (0, 2, 3, 1))
    x = jnp.pad(x, ((0, 0), (0, 0), (0, 0), (0, Cp - Cin)))
    x = x.reshape(N, H, WC)

    kernel = functools.partial(_s_recon_kernel, H=H, n_blocks=packed["n_blocks"])
    out = pl.pallas_call(
        kernel,
        out_shape=jax.ShapeDtypeStruct((N, H, WC), jnp.float32),
        grid_spec=pltpu.PrefetchScalarGridSpec(
            num_scalar_prefetch=0,
            grid=(N,),                                        # one image per grid step
            in_specs=[
                pl.BlockSpec((1, H, WC), lambda n: (n, 0, 0)),
                # constant index maps -> weights/biases staged into VMEM once
                pl.BlockSpec((L, 3, WC, WC), lambda n: (0, 0, 0, 0)),
                pl.BlockSpec((L, 1, WC), lambda n: (0, 0, 0)),
            ],
            out_specs=pl.BlockSpec((1, H, WC), lambda n: (n, 0, 0)),
            scratch_shapes=[pltpu.VMEM((H + 2, WC), jnp.float32)],
        ),
        compiler_params=pltpu.CompilerParams(
            dimension_semantics=("parallel",)),               # batch shards across v7x's 2 TCs
    )(x, packed["w"], packed["b"])

    out = out.reshape(N, H, W, Cp)[..., : packed["out_ch"]]
    return jnp.transpose(out, (0, 3, 1, 2))                   # back to NCHW


# ----------------------------------------------------------------------------
# Plain-JAX (XLA conv) reference of the same forward, for a numerical check
# ----------------------------------------------------------------------------
def _reference_forward(params, x_nchw):
    def conv(x, w, b):
        y = jax.lax.conv_general_dilated(
            x, w, window_strides=(1, 1), padding="SAME",
            dimension_numbers=("NHWC", "HWIO", "NHWC"))
        return y + b

    x = jnp.transpose(x_nchw, (0, 2, 3, 1))
    w, b = params["in"]
    h = jnp.maximum(conv(x, w, b), 0.0)
    for (w1, b1), (w2, b2) in params["blocks"]:
        y = jnp.maximum(conv(h, w1, b1), 0.0)
        h = h + conv(y, w2, b2)
    w, b = params["out"]
    out = jnp.tanh(conv(h, w, b))
    return jnp.transpose(out, (0, 3, 1, 2))


# ----------------------------------------------------------------------------
if __name__ == "__main__":
    key = jax.random.PRNGKey(0)
    k_img, k_par = jax.random.split(key)

    # RGB images, batch=2, 16x16 (consistent with the module's image-to-image forward).
    N, C, H, W = 2, 3, 16, 16
    syn_img = jax.random.uniform(k_img, (N, C, H, W), jnp.float32, -1.0, 1.0)

    params = init_s_recon_params(k_par, in_ch=C, hidden=8, n_blocks=2, out_ch=C)
    packed = pack_s_recon_params(params, W)        # pack once, reuse across calls

    fwd = jax.jit(functools.partial(s_recon_forward, packed))
    s_recon_img = fwd(syn_img)
    jax.block_until_ready(s_recon_img)

    assert s_recon_img.shape == (N, C, H, W)
    assert bool(jnp.all(jnp.isfinite(s_recon_img)))

    ref = _reference_forward(params, syn_img)
    max_err = float(jnp.max(jnp.abs(s_recon_img - ref)))
    assert max_err < 2e-2, f"mismatch vs reference conv: max abs err {max_err}"

    print("KERNEL_OK")
</pallas_src>

<mosaic_0001>
module attributes {stable_mosaic.version = 11 : i64} {
  func.func @_s_recon_kernel(%arg0: i32, %arg1: memref<1x16x128xf32, #tpu.memory_space<vmem>>, %arg2: memref<6x3x128x128xf32, #tpu.memory_space<vmem>>, %arg3: memref<6x1x128xf32, #tpu.memory_space<vmem>>, %arg4: memref<1x16x128xf32, #tpu.memory_space<vmem>>, %arg5: memref<18x128xf32, #tpu.memory_space<vmem>>) attributes {dimension_semantics = [#tpu.dimension_semantics<parallel>], iteration_bounds = array<i64: 2>, scalar_prefetch = 0 : i64, scratch_operands = 1 : i64, tpu.core_type = #tpu.core_type<tc>, window_params = [{transform_indices = @transform_0, window_bounds = array<i64: 1, 16, 128>}, {pipeline_mode = #tpu.pipeline_mode<synchronous>, transform_indices = @transform_1, window_bounds = array<i64: 6, 3, 128, 128>}, {pipeline_mode = #tpu.pipeline_mode<synchronous>, transform_indices = @transform_2, window_bounds = array<i64: 6, 1, 128>}, {transform_indices = @transform_3, window_bounds = array<i64: 1, 16, 128>}]} {
    %cst = arith.constant 0.000000e+00 : f32
    %0 = vector.broadcast %cst : f32 to vector<18x128xf32>
    %c0 = arith.constant 0 : index
    %c0_0 = arith.constant 0 : index
    %1 = vector.load %arg5[%c0, %c0_0] : memref<18x128xf32, #tpu.memory_space<vmem>>, vector<18x128xf32>
    tpu.vector_store %arg5[%c0, %c0_0], %0 {strides = array<i32>} : memref<18x128xf32, #tpu.memory_space<vmem>>, vector<18x128xf32>,
    %c0_1 = arith.constant 0 : index
    %c0_2 = arith.constant 0 : index
    %c0_3 = arith.constant 0 : index
    %2 = vector.load %arg1[%c0_1, %c0_2, %c0_3] : memref<1x16x128xf32, #tpu.memory_space<vmem>>, vector<1x16x128xf32>
    %3 = vector.shape_cast %2 : vector<1x16x128xf32> to vector<16x128xf32>
    %c1 = arith.constant 1 : index
    %c0_4 = arith.constant 0 : index
    %4 = vector.load %arg5[%c1, %c0_4] : memref<18x128xf32, #tpu.memory_space<vmem>>, vector<16x128xf32>
    tpu.vector_store %arg5[%c1, %c0_4], %3 {strides = array<i32>} : memref<18x128xf32, #tpu.memory_space<vmem>>, vector<16x128xf32>,
    %c0_5 = arith.constant 0 : index
    %c0_6 = arith.constant 0 : index
    %5 = vector.load %arg5[%c0_5, %c0_6] : memref<18x128xf32, #tpu.memory_space<vmem>>, vector<16x128xf32>
    %c0_7 = arith.constant 0 : index
    %c0_8 = arith.constant 0 : index
    %c0_9 = arith.constant 0 : index
    %c0_10 = arith.constant 0 : index
    %6 = vector.load %arg2[%c0_7, %c0_8, %c0_9, %c0_10] : memref<6x3x128x128xf32, #tpu.memory_space<vmem>>, vector<1x1x128x128xf32>
    %7 = vector.shape_cast %6 : vector<1x1x128x128xf32> to vector<128x128xf32>
    %cst_11 = arith.constant dense<0.000000e+00> : vector<16x128xf32>
    %8 = tpu.matmul %5, %7, %cst_11 {dimension_numbers = #tpu.dot_dimension_numbers<[1], [0], [0], [1], [0, 0, 1, 1], [], []>} : vector<16x128xf32>, vector<128x128xf32>, vector<16x128xf32> -> vector<16x128xf32>
    %c1_12 = arith.constant 1 : index
    %c0_13 = arith.constant 0 : index
    %9 = vector.load %arg5[%c1_12, %c0_13] : memref<18x128xf32, #tpu.memory_space<vmem>>, vector<16x128xf32>
    %c0_14 = arith.constant 0 : index
    %c1_15 = arith.constant 1 : index
    %c0_16 = arith.constant 0 : index
    %c0_17 = arith.constant 0 : index
    %10 = vector.load %arg2[%c0_14, %c1_15, %c0_16, %c0_17] : memref<6x3x128x128xf32, #tpu.memory_space<vmem>>, vector<1x1x128x128xf32>
    %11 = vector.shape_cast %10 : vector<1x1x128x128xf32> to vector<128x128xf32>
    %cst_18 = arith.constant dense<0.000000e+00> : vector<16x128xf32>
    %12 = tpu.matmul %9, %11, %cst_18 {dimension_numbers = #tpu.dot_dimension_numbers<[1], [0], [0], [1], [0, 0, 1, 1], [], []>} : vector<16x128xf32>, vector<128x128xf32>, vector<16x128xf32> -> vector<16x128xf32>
    %13 = arith.addf %8, %12 : vector<16x128xf32>
    %c2 = arith.constant 2 : index
    %c0_19 = arith.constant 0 : index
    %14 = vector.load %arg5[%c2, %c0_19] : memref<18x128xf32, #tpu.memory_space<vmem>>, vector<16x128xf32>
    %c0_20 = arith.constant 0 : index
    %c2_21 = arith.constant 2 : index
    %c0_22 = arith.constant 0 : index
    %c0_23 = arith.constant 0 : index
    %15 = vector.load %arg2[%c0_20, %c2_21, %c0_22, %c0_23] : memref<6x3x128x128xf32, #tpu.memory_space<vmem>>, vector<1x1x128x128xf32>
    %16 = vector.shape_cast %15 : vector<1x1x128x128xf32> to vector<128x128xf32>
    %cst_24 = arith.constant dense<0.000000e+00> : vector<16x128xf32>
    %17 = tpu.matmul %14, %16, %cst_24 {dimension_numbers = #tpu.dot_dimension_numbers<[1], [0], [0], [1], [0, 0, 1, 1], [], []>} : vector<16x128xf32>, vector<128x128xf32>, vector<16x128xf32> -> vector<16x128xf32>
    %18 = arith.addf %13, %17 : vector<16x128xf32>
    %c0_25 = arith.constant 0 : index
    %c0_26 = arith.constant 0 : index
    %c0_27 = arith.constant 0 : index
    %19 = vector.load %arg3[%c0_25, %c0_26, %c0_27] : memref<6x1x128xf32, #tpu.memory_space<vmem>>, vector<1x1x128xf32>
    %20 = vector.shape_cast %19 : vector<1x1x128xf32> to vector<1x128xf32>
    %21 = vector.broadcast %20 : vector<1x128xf32> to vector<16x128xf32>
    %22 = arith.addf %18, %21 : vector<16x128xf32>
    %cst_28 = arith.constant 0.000000e+00 : f32
    %23 = vector.broadcast %cst_28 : f32 to vector<16x128xf32>
    %24 = arith.maximumf %22, %23 : vector<16x128xf32>
    %c1_29 = arith.constant 1 : index
    %c0_30 = arith.constant 0 : index
    %25 = vector.load %arg5[%c1_29, %c0_30] : memref<18x128xf32, #tpu.memory_space<vmem>>, vector<16x128xf32>
    tpu.vector_store %arg5[%c1_29, %c0_30], %24 {strides = array<i32>} : memref<18x128xf32, #tpu.memory_space<vmem>>, vector<16x128xf32>,
    %c0_31 = arith.constant 0 : index
    %c0_32 = arith.constant 0 : index
    %26 = vector.load %arg5[%c0_31, %c0_32] : memref<18x128xf32, #tpu.memory_space<vmem>>, vector<16x128xf32>
    %c1_33 = arith.constant 1 : index
    %c0_34 = arith.constant 0 : index
    %c0_35 = arith.constant 0 : index
    %c0_36 = arith.constant 0 : index
    %27 = vector.load %arg2[%c1_33, %c0_34, %c0_35, %c0_36] : memref<6x3x128x128xf32, #tpu.memory_space<vmem>>, vector<1x1x128x128xf32>
    %28 = vector.shape_cast %27 : vector<1x1x128x128xf32> to vector<128x128xf32>
    %cst_37 = arith.constant dense<0.000000e+00> : vector<16x128xf32>
    %29 = tpu.matmul %26, %28, %cst_37 {dimension_numbers = #tpu.dot_dimension_numbers<[1], [0], [0], [1], [0, 0, 1, 1], [], []>} : vector<16x128xf32>, vector<128x128xf32>, vector<16x128xf32> -> vector<16x128xf32>
    %c1_38 = arith.constant 1 : index
    %c0_39 = arith.constant 0 : index
    %30 = vector.load %arg5[%c1_38, %c0_39] : memref<18x128xf32, #tpu.memory_space<vmem>>, vector<16x128xf32>
    %c1_40 = arith.constant 1 : index
    %c1_41 = arith.constant 1 : index
    %c0_42 = arith.constant 0 : index
    %c0_43 = arith.constant 0 : index
    %31 = vector.load %arg2[%c1_40, %c1_41, %c0_42, %c0_43] : memref<6x3x128x128xf32, #tpu.memory_space<vmem>>, vector<1x1x128x128xf32>
    %32 = vector.shape_cast %31 : vector<1x1x128x128xf32> to vector<128x128xf32>
    %cst_44 = arith.constant dense<0.000000e+00> : vector<16x128xf32>
    %33 = tpu.matmul %30, %32, %cst_44 {dimension_numbers = #tpu.dot_dimension_numbers<[1], [0], [0], [1], [0, 0, 1, 1], [], []>} : vector<16x128xf32>, vector<128x128xf32>, vector<16x128xf32> -> vector<16x128xf32>
    %34 = arith.addf %29, %33 : vector<16x128xf32>
    %c2_45 = arith.constant 2 : index
    %c0_46 = arith.constant 0 : index
    %35 = vector.load %arg5[%c2_45, %c0_46] : memref<18x128xf32, #tpu.memory_space<vmem>>, vector<16x128xf32>
    %c1_47 = arith.constant 1 : index
    %c2_48 = arith.constant 2 : index
    %c0_49 = arith.constant 0 : index
    %c0_50 = arith.constant 0 : index
    %36 = vector.load %arg2[%c1_47, %c2_48, %c0_49, %c0_50] : memref<6x3x128x128xf32, #tpu.memory_space<vmem>>, vector<1x1x128x128xf32>
    %37 = vector.shape_cast %36 : vector<1x1x128x128xf32> to vector<128x128xf32>
    %cst_51 = arith.constant dense<0.000000e+00> : vector<16x128xf32>
    %38 = tpu.matmul %35, %37, %cst_51 {dimension_numbers = #tpu.dot_dimension_numbers<[1], [0], [0], [1], [0, 0, 1, 1], [], []>} : vector<16x128xf32>, vector<128x128xf32>, vector<16x128xf32> -> vector<16x128xf32>
    %39 = arith.addf %34, %38 : vector<16x128xf32>
    %c1_52 = arith.constant 1 : index
    %c0_53 = arith.constant 0 : index
    %c0_54 = arith.constant 0 : index
    %40 = vector.load %arg3[%c1_52, %c0_53, %c0_54] : memref<6x1x128xf32, #tpu.memory_space<vmem>>, vector<1x1x128xf32>
    %41 = vector.shape_cast %40 : vector<1x1x128xf32> to vector<1x128xf32>
    %42 = vector.broadcast %41 : vector<1x128xf32> to vector<16x128xf32>
    %43 = arith.addf %39, %42 : vector<16x128xf32>
    %cst_55 = arith.constant 0.000000e+00 : f32
    %44 = vector.broadcast %cst_55 : f32 to vector<16x128xf32>
    %45 = arith.maximumf %43, %44 : vector<16x128xf32>
    %c1_56 = arith.constant 1 : index
    %c0_57 = arith.constant 0 : index
    %46 = vector.load %arg5[%c1_56, %c0_57] : memref<18x128xf32, #tpu.memory_space<vmem>>, vector<16x128xf32>
    tpu.vector_store %arg5[%c1_56, %c0_57], %45 {strides = array<i32>} : memref<18x128xf32, #tpu.memory_space<vmem>>, vector<16x128xf32>,
    %c0_58 = arith.constant 0 : index
    %c0_59 = arith.constant 0 : index
    %47 = vector.load %arg5[%c0_58, %c0_59] : memref<18x128xf32, #tpu.memory_space<vmem>>, vector<16x128xf32>
    %c2_60 = arith.constant 2 : index
    %c0_61 = arith.constant 0 : index
    %c0_62 = arith.constant 0 : index
    %c0_63 = arith.constant 0 : index
    %48 = vector.load %arg2[%c2_60, %c0_61, %c0_62, %c0_63] : memref<6x3x128x128xf32, #tpu.memory_space<vmem>>, vector<1x1x128x128xf32>
    %49 = vector.shape_cast %48 : vector<1x1x128x128xf32> to vector<128x128xf32>
    %cst_64 = arith.constant dense<0.000000e+00> : vector<16x128xf32>
    %50 = tpu.matmul %47, %49, %cst_64 {dimension_numbers = #tpu.dot_dimension_numbers<[1], [0], [0], [1], [0, 0, 1, 1], [], []>} : vector<16x128xf32>, vector<128x128xf32>, vector<16x128xf32> -> vector<16x128xf32>
    %c1_65 = arith.constant 1 : index
    %c0_66 = arith.constant 0 : index
    %51 = vector.load %arg5[%c1_65, %c0_66] : memref<18x128xf32, #tpu.memory_space<vmem>>, vector<16x128xf32>
    %c2_67 = arith.constant 2 : index
    %c1_68 = arith.constant 1 : index
    %c0_69 = arith.constant 0 : index
    %c0_70 = arith.constant 0 : index
    %52 = vector.load %arg2[%c2_67, %c1_68, %c0_69, %c0_70] : memref<6x3x128x128xf32, #tpu.memory_space<vmem>>, vector<1x1x128x128xf32>
    %53 = vector.shape_cast %52 : vector<1x1x128x128xf32> to vector<128x128xf32>
    %cst_71 = arith.constant dense<0.000000e+00> : vector<16x128xf32>
    %54 = tpu.matmul %51, %53, %cst_71 {dimension_numbers = #tpu.dot_dimension_numbers<[1], [0], [0], [1], [0, 0, 1, 1], [], []>} : vector<16x128xf32>, vector<128x128xf32>, vector<16x128xf32> -> vector<16x128xf32>
    %55 = arith.addf %50, %54 : vector<16x128xf32>
    %c2_72 = arith.constant 2 : index
    %c0_73 = arith.constant 0 : index
    %56 = vector.load %arg5[%c2_72, %c0_73] : memref<18x128xf32, #tpu.memory_space<vmem>>, vector<16x128xf32>
    %c2_74 = arith.constant 2 : index
    %c2_75 = arith.constant 2 : index
    %c0_76 = arith.constant 0 : index
    %c0_77 = arith.constant 0 : index
    %57 = vector.load %arg2[%c2_74, %c2_75, %c0_76, %c0_77] : memref<6x3x128x128xf32, #tpu.memory_space<vmem>>, vector<1x1x128x128xf32>
    %58 = vector.shape_cast %57 : vector<1x1x128x128xf32> to vector<128x128xf32>
    %cst_78 = arith.constant dense<0.000000e+00> : vector<16x128xf32>
    %59 = tpu.matmul %56, %58, %cst_78 {dimension_numbers = #tpu.dot_dimension_numbers<[1], [0], [0], [1], [0, 0, 1, 1], [], []>} : vector<16x128xf32>, vector<128x128xf32>, vector<16x128xf32> -> vector<16x128xf32>
    %60 = arith.addf %55, %59 : vector<16x128xf32>
    %c2_79 = arith.constant 2 : index
    %c0_80 = arith.constant 0 : index
    %c0_81 = arith.constant 0 : index
    %61 = vector.load %arg3[%c2_79, %c0_80, %c0_81] : memref<6x1x128xf32, #tpu.memory_space<vmem>>, vector<1x1x128xf32>
    %62 = vector.shape_cast %61 : vector<1x1x128xf32> to vector<1x128xf32>
    %63 = vector.broadcast %62 : vector<1x128xf32> to vector<16x128xf32>
    %64 = arith.addf %60, %63 : vector<16x128xf32>
    %65 = arith.addf %24, %64 : vector<16x128xf32>
    %c1_82 = arith.constant 1 : index
    %c0_83 = arith.constant 0 : index
    %66 = vector.load %arg5[%c1_82, %c0_83] : memref<18x128xf32, #tpu.memory_space<vmem>>, vector<16x128xf32>
    tpu.vector_store %arg5[%c1_82, %c0_83], %65 {strides = array<i32>} : memref<18x128xf32, #tpu.memory_space<vmem>>, vector<16x128xf32>,
    %c0_84 = arith.constant 0 : index
    %c0_85 = arith.constant 0 : index
    %67 = vector.load %arg5[%c0_84, %c0_85] : memref<18x128xf32, #tpu.memory_space<vmem>>, vector<16x128xf32>
    %c3 = arith.constant 3 : index
    %c0_86 = arith.constant 0 : index
    %c0_87 = arith.constant 0 : index
    %c0_88 = arith.constant 0 : index
    %68 = vector.load %arg2[%c3, %c0_86, %c0_87, %c0_88] : memref<6x3x128x128xf32, #tpu.memory_space<vmem>>, vector<1x1x128x128xf32>
    %69 = vector.shape_cast %68 : vector<1x1x128x128xf32> to vector<128x128xf32>
    %cst_89 = arith.constant dense<0.000000e+00> : vector<16x128xf32>
    %70 = tpu.matmul %67, %69, %cst_89 {dimension_numbers = #tpu.dot_dimension_numbers<[1], [0], [0], [1], [0, 0, 1, 1], [], []>} : vector<16x128xf32>, vector<128x128xf32>, vector<16x128xf32> -> vector<16x128xf32>
    %c1_90 = arith.constant 1 : index
    %c0_91 = arith.constant 0 : index
    %71 = vector.load %arg5[%c1_90, %c0_91] : memref<18x128xf32, #tpu.memory_space<vmem>>, vector<16x128xf32>
    %c3_92 = arith.constant 3 : index
    %c1_93 = arith.constant 1 : index
    %c0_94 = arith.constant 0 : index
    %c0_95 = arith.constant 0 : index
    %72 = vector.load %arg2[%c3_92, %c1_93, %c0_94, %c0_95] : memref<6x3x128x128xf32, #tpu.memory_space<vmem>>, vector<1x1x128x128xf32>
    %73 = vector.shape_cast %72 : vector<1x1x128x128xf32> to vector<128x128xf32>
    %cst_96 = arith.constant dense<0.000000e+00> : vector<16x128xf32>
    %74 = tpu.matmul %71, %73, %cst_96 {dimension_numbers = #tpu.dot_dimension_numbers<[1], [0], [0], [1], [0, 0, 1, 1], [], []>} : vector<16x128xf32>, vector<128x128xf32>, vector<16x128xf32> -> vector<16x128xf32>
    %75 = arith.addf %70, %74 : vector<16x128xf32>
    %c2_97 = arith.constant 2 : index
    %c0_98 = arith.constant 0 : index
    %76 = vector.load %arg5[%c2_97, %c0_98] : memref<18x128xf32, #tpu.memory_space<vmem>>, vector<16x128xf32>
    %c3_99 = arith.constant 3 : index
    %c2_100 = arith.constant 2 : index
    %c0_101 = arith.constant 0 : index
    %c0_102 = arith.constant 0 : index
    %77 = vector.load %arg2[%c3_99, %c2_100, %c0_101, %c0_102] : memref<6x3x128x128xf32, #tpu.memory_space<vmem>>, vector<1x1x128x128xf32>
    %78 = vector.shape_cast %77 : vector<1x1x128x128xf32> to vector<128x128xf32>
    %cst_103 = arith.constant dense<0.000000e+00> : vector<16x128xf32>
    %79 = tpu.matmul %76, %78, %cst_103 {dimension_numbers = #tpu.dot_dimension_numbers<[1], [0], [0], [1], [0, 0, 1, 1], [], []>} : vector<16x128xf32>, vector<128x128xf32>, vector<16x128xf32> -> vector<16x128xf32>
    %80 = arith.addf %75, %79 : vector<16x128xf32>
    %c3_104 = arith.constant 3 : index
    %c0_105 = arith.constant 0 : index
    %c0_106 = arith.constant 0 : index
    %81 = vector.load %arg3[%c3_104, %c0_105, %c0_106] : memref<6x1x128xf32, #tpu.memory_space<vmem>>, vector<1x1x128xf32>
    %82 = vector.shape_cast %81 : vector<1x1x128xf32> to vector<1x128xf32>
    %83 = vector.broadcast %82 : vector<1x128xf32> to vector<16x128xf32>
    %84 = arith.addf %80, %83 : vector<16x128xf32>
    %cst_107 = arith.constant 0.000000e+00 : f32
    %85 = vector.broadcast %cst_107 : f32 to vector<16x128xf32>
    %86 = arith.maximumf %84, %85 : vector<16x128xf32>
    %c1_108 = arith.constant 1 : index
    %c0_109 = arith.constant 0 : index
    %87 = vector.load %arg5[%c1_108, %c0_109] : memref<18x128xf32, #tpu.memory_space<vmem>>, vector<16x128xf32>
    tpu.vector_store %arg5[%c1_108, %c0_109], %86 {strides = array<i32>} : memref<18x128xf32, #tpu.memory_space<vmem>>, vector<16x128xf32>,
    %c0_110 = arith.constant 0 : index
    %c0_111 = arith.constant 0 : index
    %88 = vector.load %arg5[%c0_110, %c0_111] : memref<18x128xf32, #tpu.memory_space<vmem>>, vector<16x128xf32>
    %c4 = arith.constant 4 : index
    %c0_112 = arith.constant 0 : index
    %c0_113 = arith.constant 0 : index
    %c0_114 = arith.constant 0 : index
    %89 = vector.load %arg2[%c4, %c0_112, %c0_113, %c0_114] : memref<6x3x128x128xf32, #tpu.memory_space<vmem>>, vector<1x1x128x128xf32>
    %90 = vector.shape_cast %89 : vector<1x1x128x128xf32> to vector<128x128xf32>
    %cst_115 = arith.constant dense<0.000000e+00> : vector<16x128xf32>
    %91 = tpu.matmul %88, %90, %cst_115 {dimension_numbers = #tpu.dot_dimension_numbers<[1], [0], [0], [1], [0, 0, 1, 1], [], []>} : vector<16x128xf32>, vector<128x128xf32>, vector<16x128xf32> -> vector<16x128xf32>
    %c1_116 = arith.constant 1 : index
    %c0_117 = arith.constant 0 : index
    %92 = vector.load %arg5[%c1_116, %c0_117] : memref<18x128xf32, #tpu.memory_space<vmem>>, vector<16x128xf32>
    %c4_118 = arith.constant 4 : index
    %c1_119 = arith.constant 1 : index
    %c0_120 = arith.constant 0 : index
    %c0_121 = arith.constant 0 : index
    %93 = vector.load %arg2[%c4_118, %c1_119, %c0_120, %c0_121] : memref<6x3x128x128xf32, #tpu.memory_space<vmem>>, vector<1x1x128x128xf32>
    %94 = vector.shape_cast %93 : vector<1x1x128x128xf32> to vector<128x128xf32>
    %cst_122 = arith.constant dense<0.000000e+00> : vector<16x128xf32>
    %95 = tpu.matmul %92, %94, %cst_122 {dimension_numbers = #tpu.dot_dimension_numbers<[1], [0], [0], [1], [0, 0, 1, 1], [], []>} : vector<16x128xf32>, vector<128x128xf32>, vector<16x128xf32> -> vector<16x128xf32>
    %96 = arith.addf %91, %95 : vector<16x128xf32>
    %c2_123 = arith.constant 2 : index
    %c0_124 = arith.constant 0 : index
    %97 = vector.load %arg5[%c2_123, %c0_124] : memref<18x128xf32, #tpu.memory_space<vmem>>, vector<16x128xf32>
    %c4_125 = arith.constant 4 : index
    %c2_126 = arith.constant 2 : index
    %c0_127 = arith.constant 0 : index
    %c0_128 = arith.constant 0 : index
    %98 = vector.load %arg2[%c4_125, %c2_126, %c0_127, %c0_128] : memref<6x3x128x128xf32, #tpu.memory_space<vmem>>, vector<1x1x128x128xf32>
    %99 = vector.shape_cast %98 : vector<1x1x128x128xf32> to vector<128x128xf32>
    %cst_129 = arith.constant dense<0.000000e+00> : vector<16x128xf32>
    %100 = tpu.matmul %97, %99, %cst_129 {dimension_numbers = #tpu.dot_dimension_numbers<[1], [0], [0], [1], [0, 0, 1, 1], [], []>} : vector<16x128xf32>, vector<128x128xf32>, vector<16x128xf32> -> vector<16x128xf32>
    %101 = arith.addf %96, %100 : vector<16x128xf32>
    %c4_130 = arith.constant 4 : index
    %c0_131 = arith.constant 0 : index
    %c0_132 = arith.constant 0 : index
    %102 = vector.load %arg3[%c4_130, %c0_131, %c0_132] : memref<6x1x128xf32, #tpu.memory_space<vmem>>, vector<1x1x128xf32>
    %103 = vector.shape_cast %102 : vector<1x1x128xf32> to vector<1x128xf32>
    %104 = vector.broadcast %103 : vector<1x128xf32> to vector<16x128xf32>
    %105 = arith.addf %101, %104 : vector<16x128xf32>
    %106 = arith.addf %65, %105 : vector<16x128xf32>
    %c1_133 = arith.constant 1 : index
    %c0_134 = arith.constant 0 : index
    %107 = vector.load %arg5[%c1_133, %c0_134] : memref<18x128xf32, #tpu.memory_space<vmem>>, vector<16x128xf32>
    tpu.vector_store %arg5[%c1_133, %c0_134], %106 {strides = array<i32>} : memref<18x128xf32, #tpu.memory_space<vmem>>, vector<16x128xf32>,
    %c0_135 = arith.constant 0 : index
    %c0_136 = arith.constant 0 : index
    %108 = vector.load %arg5[%c0_135, %c0_136] : memref<18x128xf32, #tpu.memory_space<vmem>>, vector<16x128xf32>
    %c5 = arith.constant 5 : index
    %c0_137 = arith.constant 0 : index
    %c0_138 = arith.constant 0 : index
    %c0_139 = arith.constant 0 : index
    %109 = vector.load %arg2[%c5, %c0_137, %c0_138, %c0_139] : memref<6x3x128x128xf32, #tpu.memory_space<vmem>>, vector<1x1x128x128xf32>
    %110 = vector.shape_cast %109 : vector<1x1x128x128xf32> to vector<128x128xf32>
    %cst_140 = arith.constant dense<0.000000e+00> : vector<16x128xf32>
    %111 = tpu.matmul %108, %110, %cst_140 {dimension_numbers = #tpu.dot_dimension_numbers<[1], [0], [0], [1], [0, 0, 1, 1], [], []>} : vector<16x128xf32>, vector<128x128xf32>, vector<16x128xf32> -> vector<16x128xf32>
    %c1_141 = arith.constant 1 : index
    %c0_142 = arith.constant 0 : index
    %112 = vector.load %arg5[%c1_141, %c0_142] : memref<18x128xf32, #tpu.memory_space<vmem>>, vector<16x128xf32>
    %c5_143 = arith.constant 5 : index
    %c1_144 = arith.constant 1 : index
    %c0_145 = arith.constant 0 : index
    %c0_146 = arith.constant 0 : index
    %113 = vector.load %arg2[%c5_143, %c1_144, %c0_145, %c0_146] : memref<6x3x128x128xf32, #tpu.memory_space<vmem>>, vector<1x1x128x128xf32>
    %114 = vector.shape_cast %113 : vector<1x1x128x128xf32> to vector<128x128xf32>
    %cst_147 = arith.constant dense<0.000000e+00> : vector<16x128xf32>
    %115 = tpu.matmul %112, %114, %cst_147 {dimension_numbers = #tpu.dot_dimension_numbers<[1], [0], [0], [1], [0, 0, 1, 1], [], []>} : vector<16x128xf32>, vector<128x128xf32>, vector<16x128xf32> -> vector<16x128xf32>
    %116 = arith.addf %111, %115 : vector<16x128xf32>
    %c2_148 = arith.constant 2 : index
    %c0_149 = arith.constant 0 : index
    %117 = vector.load %arg5[%c2_148, %c0_149] : memref<18x128xf32, #tpu.memory_space<vmem>>, vector<16x128xf32>
    %c5_150 = arith.constant 5 : index
    %c2_151 = arith.constant 2 : index
    %c0_152 = arith.constant 0 : index
    %c0_153 = arith.constant 0 : index
    %118 = vector.load %arg2[%c5_150, %c2_151, %c0_152, %c0_153] : memref<6x3x128x128xf32, #tpu.memory_space<vmem>>, vector<1x1x128x128xf32>
    %119 = vector.shape_cast %118 : vector<1x1x128x128xf32> to vector<128x128xf32>
    %cst_154 = arith.constant dense<0.000000e+00> : vector<16x128xf32>
    %120 = tpu.matmul %117, %119, %cst_154 {dimension_numbers = #tpu.dot_dimension_numbers<[1], [0], [0], [1], [0, 0, 1, 1], [], []>} : vector<16x128xf32>, vector<128x128xf32>, vector<16x128xf32> -> vector<16x128xf32>
    %121 = arith.addf %116, %120 : vector<16x128xf32>
    %c5_155 = arith.constant 5 : index
    %c0_156 = arith.constant 0 : index
    %c0_157 = arith.constant 0 : index
    %122 = vector.load %arg3[%c5_155, %c0_156, %c0_157] : memref<6x1x128xf32, #tpu.memory_space<vmem>>, vector<1x1x128xf32>
    %123 = vector.shape_cast %122 : vector<1x1x128xf32> to vector<1x128xf32>
    %124 = vector.broadcast %123 : vector<1x128xf32> to vector<16x128xf32>
    %125 = arith.addf %121, %124 : vector<16x128xf32>
    %126 = math.tanh %125 : vector<16x128xf32>
    %c0_158 = arith.constant 0 : index
    %c0_159 = arith.constant 0 : index
    %c0_160 = arith.constant 0 : index
    %127 = vector.load %arg4[%c0_158, %c0_159, %c0_160] : memref<1x16x128xf32, #tpu.memory_space<vmem>>, vector<1x16x128xf32>
    %128 = vector.shape_cast %127 : vector<1x16x128xf32> to vector<16x128xf32>
    %129 = vector.shape_cast %126 : vector<16x128xf32> to vector<1x16x128xf32>
    tpu.vector_store %arg4[%c0_158, %c0_159, %c0_160], %129 {strides = array<i32>} : memref<1x16x128xf32, #tpu.memory_space<vmem>>, vector<1x16x128xf32>,
    return
  }
  func.func @transform_0(%arg0: i32) -> (i32, i32, i32) {
    %c0_i32 = arith.constant 0 : i32
    %c0_i32_0 = arith.constant 0 : i32
    %c0_i32_1 = arith.constant 0 : i32
    return %arg0, %c0_i32, %c0_i32_0 : i32, i32, i32
  }
  func.func @transform_1(%arg0: i32) -> (i32, i32, i32, i32) {
    %c0_i32 = arith.constant 0 : i32
    %c0_i32_0 = arith.constant 0 : i32
    %c0_i32_1 = arith.constant 0 : i32
    %c0_i32_2 = arith.constant 0 : i32
    %c0_i32_3 = arith.constant 0 : i32
    return %c0_i32, %c0_i32_0, %c0_i32_1, %c0_i32_2 : i32, i32, i32, i32
  }
  func.func @transform_2(%arg0: i32) -> (i32, i32, i32) {
    %c0_i32 = arith.constant 0 : i32
    %c0_i32_0 = arith.constant 0 : i32
    %c0_i32_1 = arith.constant 0 : i32
    %c0_i32_2 = arith.constant 0 : i32
    return %c0_i32, %c0_i32_0, %c0_i32_1 : i32, i32, i32
  }
  func.func @transform_3(%arg0: i32) -> (i32, i32, i32) {
    %c0_i32 = arith.constant 0 : i32
    %c0_i32_0 = arith.constant 0 : i32
    %c0_i32_1 = arith.constant 0 : i32
    return %arg0, %c0_i32, %c0_i32_0 : i32, i32, i32
  }
}

</mosaic_0001>

<bundles_post_ra>
// kernel: s_recon_forward.1
= control target key start
LH: loop header
LB: loop body
LE: loop exit
PB: predicated region body
PF: predicated region fallthrough
CT: control target
= control target key end

     0   :  { %8 = vsyncpa [#allocation4], 0  ;;  %s3905_s0 = inlined_call_operand.vmem [shape: f32[2,16,128], index: 0, kind: input, shape index: {}]   ;;  %s3906_s1 = inlined_call_operand.hbm [shape: f32[6,3,128,128], index: 1, kind: input, shape index: {}]   ;;  %s3907_s2 = inlined_call_operand.hbm [shape: f32[6,1,128], index: 2, kind: input, shape index: {}]   ;;  %s3908_s3 = inlined_call_operand.vmem [shape: f32[2,16,128], index: 3, kind: output, shape index: {}]  }
   0x1   :  { %9 = vsyncpa [#allocation6], 0  ;;  %s3785_s12 = smov 0  }
   0x2 LB: > { %s3758_s13 = smov [#allocation3]   ;;  %s3791_s15 = sadd.s32 4294967295, %s3756_s12   ;;  %s3756_s12 = sphi %s3785_s12, %s15_s12  }
   0x3   : > { %s126_s14 = sshll.u32 %s3758_s13, 4  ;;  %p2073_p0 = scmp.ge.s32.totalorder %s3756_s12, 1  ;;  %s127_s14 = int_to_ptr.vmem [resolvable:$true] %s126_s14 }
   0x4   : > { %p114_p1 = scmp.lt.s32.totalorder %s3756_s12, 3  ;;  %p3909_p3 = scmp.eq.s32.totalorder %s3791_s15, 0 }
   0x5   : > { %s3759_s17 = smov [#allocation5]   ;;  %s3686_s22 = scalar_lea.hbm %s3906_s1, 36864 }
   0x6   : > { %p3795_p2 = pnand %p2073_p0, %p114_p1  ;;  %s139_s18 = sshll.u32 %s3759_s17, 4  ;;  %s3808_s18 = int_to_ptr.vmem [resolvable:$true] %s139_s18 }
   0x7   : > { %p3687_p6 = scmp.ne.s32.totalorder %s3906_s1, %s3686_s22  ;;  %p3693_p10 = scmp.lt.u32.totalorder %s3686_s22, %s3906_s1 }
   0x8   : > { %s3911_s16 = scalar_select %p3795_p2, 1, 0 }
   0x9   : > { %p3656_p4 = pneg %p3795_p2 }
   0xb   : > { %p3804_p5 = pnand %p3909_p3, %p3656_p4 }
   0xd   : > { %p3688_p7 = pneg %p3804_p5 }
   0xf   : > { %p3689_p8 = pnand %p3688_p7, %p3687_p6 }
  0x11   : > { %p3690_p9 = pneg %p3689_p8 }
  0x13   : > { %p3695_p11 = pnand %p3693_p10, %p3690_p9 }
  0x15   : > { %3698 = shalt.err (!%p3695_p11)
}
  0x16   : > { %s3699_s27 = scalar_lea.vmem %s127_s14, 36864  ;;  %p3707_p1 = scmp.lt.s32.totalorder %s127_s14, %s127_s14 }
  0x17   : > { %p3700_p12 = scmp.ne.s32.totalorder %s127_s14, %s3699_s27  ;;  %p3708_p4 = scmp.lt.s32.totalorder %s3699_s27, %s3699_s27 }
  0x19   : > { %p3702_p13 = pnand %p3700_p12, %p3688_p7  ;;  %p3709_p3 = por %p3708_p4, %p3707_p1 }
  0x1b   : > { %p3703_p0 = pneg %p3702_p13 }
  0x1d   : > { %p3710_p2 = pnand %p3709_p3, %p3703_p0 }
  0x1f   : > { %3713 = shalt.err (!%p3710_p2)
}
  0x20   : > { %s3760_s28 = smov 128   ;;  %s3761_s29 = smov 8  }
  0x21   : > { %3659 = dma.hbm_to_vmem [thread:$0]  (!%p3804_p5), %s3906_s1, 36864, %s127_s14, [#allocation4], %s3760_s28, %s3760_s28, %s3761_s29  }
  0x22   : > { %s3714_s7 = scalar_lea.hbm %s3907_s2, 96 }
  0x23   : > { %p3715_p6 = scmp.ne.s32.totalorder %s3907_s2, %s3714_s7  ;;  %p3721_p8 = scmp.lt.u32.totalorder %s3714_s7, %s3907_s2 }
  0x25   : > { %p3717_p2 = pnand %p3715_p6, %p3688_p7 }
  0x27   : > { %p3718_p3 = pneg %p3717_p2 }
  0x29   : > { %p3723_p9 = pnand %p3721_p8, %p3718_p3 }
  0x2b   : > { %3726 = shalt.err (!%p3723_p9)
}
  0x2c   : > { %s3727_s13 = scalar_lea.vmem %s3808_s18, 96  ;;  %p3735_p13 = scmp.lt.s32.totalorder %s3808_s18, %s3808_s18 }
  0x2d   : > { %p3728_p10 = scmp.ne.s32.totalorder %s3808_s18, %s3727_s13  ;;  %p3736_p0 = scmp.lt.s32.totalorder %s3727_s13, %s3727_s13 }
  0x2f   : > { %p3730_p11 = pnand %p3728_p10, %p3688_p7  ;;  %p3737_p1 = por %p3736_p0, %p3735_p13 }
  0x31   : > { %p3731_p12 = pneg %p3730_p11 }
  0x33   : > { %p3738_p4 = pnand %p3737_p1, %p3731_p12 }
  0x35   : > { %3741 = shalt.err (!%p3738_p4)
}
  0x36   : > { %s3762_s14 = smov 16   ;;  %s3763_s17 = smov 1  }
  0x37   : > { %3662 = dma.hbm_to_vmem [thread:$0]  (!%p3804_p5), %s3907_s2, 96, %s3808_s18, [#allocation6], %s3762_s14, %s3762_s14, %s3763_s17  }
  0x38   : > { %p3913_p6 = scmp.ne.s32.totalorder %s3911_s16, 0 }
  0x39   : > { %p3914_p7 = scmp.eq.s32.totalorder (!%p3913_p6), %s3791_s15, 0 }
  0x3a   : > { %163 = sbr.rel (%p3913_p6) target bundleno = 1806 (0x70e), region = 32 }
  0x41   : > { %3747 = dma.done.wait (%p3914_p7), [#allocation4], 36864   ;;  %p3915_p2 = pmov %p3914_p7 }
  0x43   : > { %3749 = vsyncadd (%p3915_p2), [#allocation4], 4294930432  ;;  %p3916_p3 = pmov %p3915_p2 }
  0x44   : > { %p3917_p8 = pmov %p3915_p2 }
  0x45   : > { %3751 = dma.done.wait (%p3916_p3), [#allocation6], 96  }
  0x46   : > { %3753 = vsyncadd (%p3917_p8), [#allocation6], 4294967200  ;;  %p191_p9 = scmp.lt.s32.totalorder %s3791_s15, 1  ;;  %v3764_v0 = vmov 0.0   ;;  %v229_v1 = vld [vmem:[#allocation3 + $0x80] sm:$0xff]  ;;  %v230_v2 = vld [vmem:[#allocation3 + $0x88] sm:$0xff] }
  0x47   : > { %201 = vst [vmem:[#allocation2] sm:$0xff] %v3764_v0  ;;  %202 = vst [vmem:[#allocation2 + $0x8] sm:$0xff] %v3764_v0  ;;  %v231_v3 = vld [vmem:[#allocation3 + $0x90] sm:$0xff]  ;;  %v3048_v4 = vpack.c.bf16 %v230_v2, %v229_v1  ;;  %v232_v5 = vld [vmem:[#allocation3 + $0x98] sm:$0xff] }
  0x48   : > { %203 = vst [vmem:[#allocation2 + $0x10] sm:$0x3] %v3764_v0  ;;  %s3919_s15 = smov (!%p191_p9, %s3791_s15), 1  ;;  %v3052_v6 = vpack.c.bf16 %v232_v5, %v231_v3  ;;  %v233_v7 = vld [vmem:[#allocation3 + $0xa0] sm:$0xff]  ;;  %v234_v8 = vld [vmem:[#allocation3 + $0xa8] sm:$0xff]  ;;  %v235_v11 = vld [vmem:[#allocation3 + $0xb0] sm:$0xff] }
  0x49   : > { %s2092_s16 = sshll.u32 %s3919_s15, 4  ;;  %3049 = vmatprep.subr.bf16.mxu0 %v3048_v4  ;;  %v3056_v9 = vpack.c.bf16 %v234_v8, %v233_v7  ;;  %v236_v12 = vld [vmem:[#allocation3 + $0xb8] sm:$0xff]  ;;  %v237_v15 = vld [vmem:[#allocation3 + $0xc0] sm:$0xff]  ;;  %v238_v16 = vld [vmem:[#allocation3 + $0xc8] sm:$0xff] }
  0x4a   : > { %s195_s22 = scalar_lea.vmem %s3905_s0, %s2092_s16  ;;  %3051 = vmatpush3.bf16.msra.mxu0 %v3048_v4  ;;  %v3060_v14 = vpack.c.bf16 %v236_v12, %v235_v11  ;;  %v3064_v17 = vpack.c.bf16 %v238_v16, %v237_v15  ;;  %v239_v18 = vld [vmem:[#allocation3 + $0xd0] sm:$0xff]  ;;  %v240_v19 = vld [vmem:[#allocation3 + $0xd8] sm:$0xff]  ;;  %v241_v21 = vld [vmem:[#allocation3 + $0xe0] sm:$0xff]  ;;  %s200_s25 = scalar_lea.vmem %s3908_s3, %s2092_s16 }
  0x4b   : > { %3053 = vmatprep.subr.bf16.mxu0 %v3052_v6  ;;  %v204_v10 = vld [vmem:[%s195_s22] sm:$0xff]  ;;  %v205_v13 = vld [vmem:[%s195_s22 + $0x8] sm:$0xff]  ;;  %v3068_v20 = vpack.c.bf16 %v240_v19, %v239_v18  ;;  %v526_v23 = vld [vmem:[#allocation3 + $0x200] sm:$0xff] }
  0x4c   : > { %206 = vst [vmem:[#allocation2 + $0x1] sm:$0xff] %v204_v10  ;;  %2450 = vmatprep.mubr.f32.mxu0 %v204_v10  ;;  %207 = vst [vmem:[#allocation2 + $0x9] sm:$0xff] %v205_v13  ;;  %v242_v22 = vld [vmem:[#allocation3 + $0xe8] sm:$0xff]  ;;  %v528_v25 = vld [vmem:[#allocation3 + $0x210] sm:$0xff] }
  0x4d   : > { %v527_v24 = vld [vmem:[#allocation3 + $0x208] sm:$0xff]  ;;  %v529_v27 = vld [vmem:[#allocation3 + $0x218] sm:$0xff]  ;;  %v530_v29 = vld [vmem:[#allocation3 + $0x220] sm:$0xff]  ;;  %v3072_v31 = vpack.c.bf16 %v242_v22, %v241_v21 }
  0x4e   : > { %3055 = vmatpush3.bf16.msra.mxu0 %v3052_v6  ;;  %v3144_v26 = vpack.c.bf16 %v527_v24, %v526_v23  ;;  %v3148_v28 = vpack.c.bf16 %v529_v27, %v528_v25  ;;  %v531_v30 = vld [vmem:[#allocation3 + $0x228] sm:$0xff]  ;;  %v243_v32 = vld [vmem:[#allocation3 + $0xf0] sm:$0xff]  ;;  %v244_v33 = vld [vmem:[#allocation3 + $0xf8] sm:$0xff] }
  0x4f   : > { %3057 = vmatprep.subr.bf16.mxu0 %v3056_v9  ;;  %v3152_v34 = vpack.c.bf16 %v531_v30, %v530_v29  ;;  %v532_v35 = vld [vmem:[#allocation3 + $0x230] sm:$0xff]  ;;  %v533_v36 = vld [vmem:[#allocation3 + $0x238] sm:$0xff]  ;;  %v3076_v37 = vpack.c.bf16 %v244_v33, %v243_v32  ;;  %v210_v38 = vld [vmem:[#allocation3] sm:$0xff] }
  0x50   : > { %3145 = vmatprep.subr.bf16.mxu1 %v3144_v26  ;;  %v211_v39 = vld [vmem:[#allocation3 + $0x8] sm:$0xff]  ;;  %v3156_v40 = vpack.c.bf16 %v533_v36, %v532_v35  ;;  %v534_v41 = vld [vmem:[#allocation3 + $0x240] sm:$0xff]  ;;  %v212_v44 = vld [vmem:[#allocation3 + $0x10] sm:$0xff] }
  0x51   : > { %3147 = vmatpush3.bf16.msra.mxu1 %v3144_v26  ;;  %v535_v42 = vld [vmem:[#allocation3 + $0x248] sm:$0xff]  ;;  %v3080_v43 = vpack.c.bf16 %v211_v39, %v210_v38  ;;  %v213_v45 = vld [vmem:[#allocation3 + $0x18] sm:$0xff]  ;;  %v214_v49 = vld [vmem:[#allocation3 + $0x20] sm:$0xff] }
  0x52   : > { %3059 = vmatpush3.bf16.msra.mxu0 %v3056_v9  ;;  %3149 = vmatprep.subr.bf16.mxu1 %v3148_v28  ;;  %v3160_v46 = vpack.c.bf16 %v535_v42, %v534_v41  ;;  %v3084_v47 = vpack.c.bf16 %v213_v45, %v212_v44  ;;  %v215_v50 = vld [vmem:[#allocation3 + $0x28] sm:$0xff]  ;;  %v216_v52 = vld [vmem:[#allocation3 + $0x30] sm:$0xff]  ;;  %v217_v53 = vld [vmem:[#allocation3 + $0x38] sm:$0xff] }
  0x53   : > { %3061 = vmatprep.subr.bf16.mxu0 %v3060_v14  ;;  %v208_v48 = vld [vmem:[#allocation2] sm:$0xff]  ;;  %v3088_v51 = vpack.c.bf16 %v215_v50, %v214_v49  ;;  %v3092_v54 = vpack.c.bf16 %v217_v53, %v216_v52  ;;  %v218_v55 = vld [vmem:[#allocation3 + $0x40] sm:$0xff]  ;;  %v220_v58 = vld [vmem:[#allocation3 + $0x50] sm:$0xff] }
  0x54   : > { %v219_v56 = vld [vmem:[#allocation3 + $0x48] sm:$0xff]  ;;  %v221_v59 = vld [vmem:[#allocation3 + $0x58] sm:$0xff]  ;;  %v222_v61 = vld [vmem:[#allocation3 + $0x60] sm:$0xff] }
  0x55   : > { %3151 = vmatpush3.bf16.msra.mxu1 %v3148_v28  ;;  %v3096_v57 = vpack.c.bf16 %v219_v56, %v218_v55  ;;  %v3100_v60 = vpack.c.bf16 %v221_v59, %v220_v58  ;;  %v223_v62 = vld [vmem:[#allocation3 + $0x68] sm:$0xff]  ;;  %v224_v0 = vld [vmem:[#allocation3 + $0x70] sm:$0xff]  ;;  %v225_v1 = vld [vmem:[#allocation3 + $0x78] sm:$0xff] }
  0x56   : > { %3063 = vmatpush3.bf16.msra.mxu0 %v3060_v14  ;;  %3153 = vmatprep.subr.bf16.mxu1 %v3152_v34  ;;  %v3104_v63 = vpack.c.bf16 %v223_v62, %v222_v61  ;;  %v3108_v2 = vpack.c.bf16 %v225_v1, %v224_v0  ;;  %v398_v3 = vld [vmem:[#allocation3 + $0x100] sm:$0xff]  ;;  %v399_v4 = vld [vmem:[#allocation3 + $0x108] sm:$0xff]  ;;  %v400_v6 = vld [vmem:[#allocation3 + $0x110] sm:$0xff] }
  0x57   : > { %3065 = vmatprep.subr.bf16.mxu0 %v3064_v17  ;;  %v3112_v5 = vpack.c.bf16 %v399_v4, %v398_v3  ;;  %v401_v7 = vld [vmem:[#allocation3 + $0x118] sm:$0xff]  ;;  %v209_v8 = vld [vmem:[#allocation2 + $0x8] sm:$0xff]  ;;  %v402_v11 = vld [vmem:[#allocation3 + $0x120] sm:$0xff] }
  0x58   : > { %v3116_v9 = vpack.c.bf16 %v401_v7, %v400_v6  ;;  %v395_v10 = vld [vmem:[#allocation2 + $0x2] sm:$0xff]  ;;  %v405_v15 = vld [vmem:[#allocation3 + $0x138] sm:$0xff]  ;;  %v410_v23 = vld [vmem:[#allocation3 + $0x160] sm:$0xff] }
  0x59   : > { %3155 = vmatpush3.bf16.msra.mxu1 %v3152_v34  ;;  %v403_v12 = vld [vmem:[#allocation3 + $0x128] sm:$0xff]  ;;  %v404_v14 = vld [vmem:[#allocation3 + $0x130] sm:$0xff]  ;;  %v409_v21 = vld [vmem:[#allocation3 + $0x158] sm:$0xff] }
  0x5a   : > { %3067 = vmatpush3.bf16.msra.mxu0 %v3064_v17  ;;  %3157 = vmatprep.subr.bf16.mxu1 %v3156_v40  ;;  %v3124_v16 = vpack.c.bf16 %v405_v15, %v404_v14  ;;  %v406_v17 = vld [vmem:[#allocation3 + $0x140] sm:$0xff]  ;;  %v407_v18 = vld [vmem:[#allocation3 + $0x148] sm:$0xff]  ;;  %v412_v26 = vld [vmem:[#allocation3 + $0x170] sm:$0xff] }
  0x5b   : > { %3069 = vmatprep.subr.bf16.mxu0 %v3068_v20  ;;  %v3128_v19 = vpack.c.bf16 %v407_v18, %v406_v17  ;;  %v411_v24 = vld [vmem:[#allocation3 + $0x168] sm:$0xff]  ;;  %v413_v27 = vld [vmem:[#allocation3 + $0x178] sm:$0xff]  ;;  %v536_v30 = vld [vmem:[#allocation3 + $0x250] sm:$0xff] }
  0x5c   : > { %v3136_v25 = vpack.c.bf16 %v411_v24, %v410_v23  ;;  %v3140_v28 = vpack.c.bf16 %v413_v27, %v412_v26  ;;  %v396_v29 = vld [vmem:[#allocation2 + $0xa] sm:$0xff]  ;;  %v538_v33 = vld [vmem:[#allocation3 + $0x260] sm:$0xff]  ;;  %v539_v34 = vld [vmem:[#allocation3 + $0x268] sm:$0xff] }
  0x5d   : > { %3159 = vmatpush3.bf16.msra.mxu1 %v3156_v40  ;;  %v3168_v35 = vpack.c.bf16 %v539_v34, %v538_v33  ;;  %v540_v36 = vld [vmem:[#allocation3 + $0x270] sm:$0xff]  ;;  %v507_v39 = vld [vmem:[#allocation3 + $0x180] sm:$0xff]  ;;  %v508_v40 = vld [vmem:[#allocation3 + $0x188] sm:$0xff] }
  0x5e   : > { %3071 = vmatpush3.bf16.msra.mxu0 %v3068_v20  ;;  %3161 = vmatprep.subr.bf16.mxu1 %v3160_v46  ;;  %v408_v20 = vld [vmem:[#allocation3 + $0x150] sm:$0xff]  ;;  %v3176_v41 = vpack.c.bf16 %v508_v40, %v507_v39  ;;  %v824_v42 = vld [vmem:[#allocation3 + $0x380] sm:$0xff]  ;;  %v829_v49 = vld [vmem:[#allocation3 + $0x3a8] sm:$0xff] }
  0x5f   : > { %3073 = vmatprep.subr.bf16.mxu0 %v3072_v31  ;;  %v3132_v22 = vpack.c.bf16 %v409_v21, %v408_v20  ;;  %v826_v44 = vld [vmem:[#allocation3 + $0x390] sm:$0xff]  ;;  %v831_v52 = vld [vmem:[#allocation3 + $0x3b8] sm:$0xff]  ;;  %v833_v55 = vld [vmem:[#allocation3 + $0x3c8] sm:$0xff] }
  0x60   : > { %v509_v62 = vld [vmem:[#allocation3 + $0x190] sm:$0xff]  ;;  %v511_v3 = vld [vmem:[#allocation3 + $0x1a0] sm:$0xff]  ;;  %v512_v4 = vld [vmem:[#allocation3 + $0x1a8] sm:$0xff] }
  0x61   : > { %3163 = vmatpush3.bf16.msra.mxu1 %v3160_v46  ;;  %v827_v46 = vld [vmem:[#allocation3 + $0x398] sm:$0xff]  ;;  %v513_v6 = vld [vmem:[#allocation3 + $0x1b0] sm:$0xff]  ;;  %v520_v17 = vld [vmem:[#allocation3 + $0x1e8] sm:$0xff] }
  0x62   : > { %3075 = vmatpush3.bf16.msra.mxu0 %v3072_v31  ;;  %v537_v31 = vld [vmem:[#allocation3 + $0x258] sm:$0xff]  ;;  %v696_v23 = vld [vmem:[#allocation3 + $0x288] sm:$0xff]  ;;  %v701_v33 = vld [vmem:[#allocation3 + $0x2b0] sm:$0xff] }
  0x63   : > { %3077 = vmatprep.subr.bf16.mxu0 %v3076_v37  ;;  %v3164_v32 = vpack.c.bf16 %v537_v31, %v536_v30  ;;  %v514_v7 = vld [vmem:[#allocation3 + $0x1b8] sm:$0xff]  ;;  %v700_v30 = vld [vmem:[#allocation3 + $0x2a8] sm:$0xff]  ;;  %v705_v39 = vld [vmem:[#allocation3 + $0x2d0] sm:$0xff] }
  0x64   : > { %v518_v14 = vld [vmem:[#allocation3 + $0x1d8] sm:$0xff] }
  0x65   : > { %3165 = vmatprep.subr.bf16.mxu1 %v3164_v32  ;;  %v522_v20 = vld [vmem:[#allocation3 + $0x1f8] sm:$0xff] }
  0x66   : > { %3079 = vmatpush3.bf16.msra.mxu0 %v3076_v37  ;;  %3167 = vmatpush3.bf16.msra.mxu1 %v3164_v32  ;;  %v541_v37 = vld [vmem:[#allocation3 + $0x278] sm:$0xff] }
  0x67   : > { %3081 = vmatprep.subr.bf16.mxu0 %v3080_v43  ;;  %3169 = vmatprep.subr.bf16.mxu1 %v3168_v35  ;;  %v3172_v38 = vpack.c.bf16 %v541_v37, %v540_v36  ;;  %v698_v26 = vld [vmem:[#allocation3 + $0x298] sm:$0xff]  ;;  %v703_v36 = vld [vmem:[#allocation3 + $0x2c0] sm:$0xff]  ;;  %v704_v37 = vld [vmem:[#allocation3 + $0x2c8] sm:$0xff] }
  0x68   : > { %v702_v34 = vld [vmem:[#allocation3 + $0x2b8] sm:$0xff] }
  0x69   : > { %2451 = vmatmul.mubr.f32.vlgmr.msra.gmra.mrb[0].mxu0 %v205_v13  ;;  %v3120_v13 = vpack.c.bf16 %v403_v12, %v402_v11  ;;  %v516_v11 = vld [vmem:[#allocation3 + $0x1c8] sm:$0xff]  ;;  %v706_v40 = vld [vmem:[#allocation3 + $0x2d8] sm:$0xff] }
  0x6a   : > { %3083 = vmatpush3.bf16.msra.mxu0 %v3080_v43  ;;  %2485 = vmatprep.mubr.f32.mxu0 %v208_v48  ;;  %v825_v43 = vld [vmem:[#allocation3 + $0x388] sm:$0xff]  ;;  %v828_v48 = vld [vmem:[#allocation3 + $0x3a0] sm:$0xff] }
  0x6b   : > { %3085 = vmatprep.subr.bf16.mxu0 %v3084_v47  ;;  %3171 = vmatpush3.bf16.msra.mxu1 %v3168_v35  ;;  %v3240_v45 = vpack.c.bf16 %v825_v43, %v824_v42  ;;  %v3248_v50 = vpack.c.bf16 %v829_v49, %v828_v48  ;;  %v3220_v35 = vpack.c.bf16 %v702_v34, %v701_v33  ;;  %v707_v42 = vld [vmem:[#allocation3 + $0x2e0] sm:$0xff]  ;;  %v708_v43 = vld [vmem:[#allocation3 + $0x2e8] sm:$0xff]  ;;  %v834_v49 = vld [vmem:[#allocation3 + $0x3d0] sm:$0xff] }
  0x6c   : > { %3173 = vmatprep.subr.bf16.mxu1 %v3172_v38  ;;  %v815_v34 = vld [vmem:[#allocation3 + $0x350] sm:$0xff] }
  0x6e   : > { %3087 = vmatpush3.bf16.msra.mxu0 %v3084_v47  ;;  %v3244_v47 = vpack.c.bf16 %v827_v46, %v826_v44  ;;  %v3232_v44 = vpack.c.bf16 %v708_v43, %v707_v42  ;;  %v710_v46 = vld [vmem:[#allocation3 + $0x2f8] sm:$0xff]  ;;  %v993_v43 = vld [vmem:[#allocation3 + $0x400] sm:$0xff] }
  0x6f   : > { %3089 = vmatprep.subr.bf16.mxu0 %v3088_v51  ;;  %3175 = vmatpush3.bf16.msra.mxu1 %v3172_v38  ;;  %v3224_v38 = vpack.c.bf16 %v704_v37, %v703_v36  ;;  %v817_v37 = vld [vmem:[#allocation3 + $0x360] sm:$0xff] }
  0x70   : > { %3177 = vmatprep.subr.bf16.mxu1 %v3176_v41 }
  0x72   : > { %3091 = vmatpush3.bf16.msra.mxu0 %v3088_v51  ;;  %v830_v51 = vld [vmem:[#allocation3 + $0x3b0] sm:$0xff] }
  0x73   : > { %3093 = vmatprep.subr.bf16.mxu0 %v3092_v54  ;;  %v3252_v53 = vpack.c.bf16 %v831_v52, %v830_v51  ;;  %v836_v52 = vld [vmem:[#allocation3 + $0x3e0] sm:$0xff] }
  0x76   : > { %3095 = vmatpush3.bf16.msra.mxu0 %v3092_v54  ;;  %v832_v54 = vld [vmem:[#allocation3 + $0x3c0] sm:$0xff] }
  0x77   : > { %3097 = vmatprep.subr.bf16.mxu0 %v3096_v57  ;;  %v3256_v56 = vpack.c.bf16 %v833_v55, %v832_v54  ;;  %v838_v55 = vld [vmem:[#allocation3 + $0x3f0] sm:$0xff] }
  0x7a   : > { %3099 = vmatpush3.bf16.msra.mxu0 %v3096_v57  ;;  %v2084_v57 = vld [vmem:[#allocation5] ss:$0 sm:$0xff] }
  0x7b   : > { %3101 = vmatprep.subr.bf16.mxu0 %v3100_v60 }
  0x7e   : > { %3103 = vmatpush3.bf16.msra.mxu0 %v3100_v60 }
  0x7f   : > { %3105 = vmatprep.subr.bf16.mxu0 %v3104_v63 }
  0x82   : > { %3107 = vmatpush3.bf16.msra.mxu0 %v3104_v63  ;;  %v510_v63 = vld [vmem:[#allocation3 + $0x198] sm:$0xff] }
  0x83   : > { %3109 = vmatprep.subr.bf16.mxu0 %v3108_v2 }
  0x86   : > { %3111 = vmatpush3.bf16.msra.mxu0 %v3108_v2  ;;  %v3180_v2 = vpack.c.bf16 %v510_v63, %v509_v62  ;;  %v1123_v62 = vld [vmem:[#allocation3 + $0x508] sm:$0xff]  ;;  %v1124_v63 = vld [vmem:[#allocation3 + $0x510] sm:$0xff] }
  0x87   : > { %3113 = vmatprep.subr.bf16.mxu0 %v3112_v5 }
  0x89   : > { %2486 = vmatmul.mubr.f32.vlgmr.msra.gmra.mrb[0].mxu0 %v209_v8 }
  0x8a   : > { %3115 = vmatpush3.bf16.msra.mxu0 %v3112_v5  ;;  %2520 = vmatprep.mubr.f32.mxu0 %v395_v10  ;;  %v3184_v5 = vpack.c.bf16 %v512_v4, %v511_v3  ;;  %v515_v10 = vld [vmem:[#allocation3 + $0x1c0] sm:$0xff]  ;;  %v1125_v3 = vld [vmem:[#allocation3 + $0x518] sm:$0xff] }
  0x8b   : > { %3117 = vmatprep.subr.bf16.mxu0 %v3116_v9  ;;  %v3192_v12 = vpack.c.bf16 %v516_v11, %v515_v10  ;;  %v3340_v4 = vpack.c.bf16 %v1125_v3, %v1124_v63  ;;  %v1130_v11 = vld [vmem:[#allocation3 + $0x540] sm:$0xff] }
  0x8c   : > { %v1005_v63 = vld [vmem:[#allocation3 + $0x460] sm:$0xff] }
  0x8e   : > { %3119 = vmatpush3.bf16.msra.mxu0 %v3116_v9  ;;  %v3188_v9 = vpack.c.bf16 %v514_v7, %v513_v6  ;;  %v1127_v6 = vld [vmem:[#allocation3 + $0x528] sm:$0xff] }
  0x8f   : > { %3121 = vmatprep.subr.bf16.mxu0 %v3120_v13 }
  0x92   : > { %3123 = vmatpush3.bf16.msra.mxu0 %v3120_v13  ;;  %v517_v13 = vld [vmem:[#allocation3 + $0x1d0] sm:$0xff] }
  0x93   : > { %3125 = vmatprep.subr.bf16.mxu0 %v3124_v16  ;;  %v3196_v15 = vpack.c.bf16 %v518_v14, %v517_v13  ;;  %v2085_v14 = vld [vmem:[#allocation5 + $0x1] ss:$0 sm:$0xff] }
  0x96   : > { %3127 = vmatpush3.bf16.msra.mxu0 %v3124_v16  ;;  %v519_v16 = vld [vmem:[#allocation3 + $0x1e0] sm:$0xff] }
  0x97   : > { %3129 = vmatprep.subr.bf16.mxu0 %v3128_v19  ;;  %v3200_v18 = vpack.c.bf16 %v520_v17, %v519_v16 }
  0x9a   : > { %3131 = vmatpush3.bf16.msra.mxu0 %v3128_v19  ;;  %v521_v19 = vld [vmem:[#allocation3 + $0x1f0] sm:$0xff] }
  0x9b   : > { %3133 = vmatprep.subr.bf16.mxu0 %v3132_v22  ;;  %v3204_v21 = vpack.c.bf16 %v522_v20, %v521_v19  ;;  %v807_v19 = vld [vmem:[#allocation3 + $0x310] sm:$0xff]  ;;  %v808_v20 = vld [vmem:[#allocation3 + $0x318] sm:$0xff] }
  0x9e   : > { %3135 = vmatpush3.bf16.msra.mxu0 %v3132_v22  ;;  %v695_v22 = vld [vmem:[#allocation3 + $0x280] sm:$0xff] }
  0x9f   : > { %3137 = vmatprep.subr.bf16.mxu0 %v3136_v25  ;;  %v3208_v24 = vpack.c.bf16 %v696_v23, %v695_v22  ;;  %v3276_v23 = vpack.c.bf16 %v808_v20, %v807_v19  ;;  %v1420_v20 = vld [vmem:[#allocation3 + $0x680] sm:$0xff] }
  0xa2   : > { %3139 = vmatpush3.bf16.msra.mxu0 %v3136_v25  ;;  %v697_v25 = vld [vmem:[#allocation3 + $0x290] sm:$0xff] }
  0xa3   : > { %3141 = vmatprep.subr.bf16.mxu0 %v3140_v28  ;;  %v3212_v27 = vpack.c.bf16 %v698_v26, %v697_v25  ;;  %v810_v25 = vld [vmem:[#allocation3 + $0x328] sm:$0xff] }
  0xa6   : > { %3143 = vmatpush3.bf16.msra.mxu0 %v3140_v28 }
  0xa7   : > { %3241 = vmatprep.subr.bf16.mxu0 %v3240_v45 }
  0xa9   : > { %2521 = vmatmul.mubr.f32.vlgmr.msra.gmra.mrb[0].mxu0 %v396_v29  ;;  %v699_v29 = vld [vmem:[#allocation3 + $0x2a0] sm:$0xff] }
  0xaa   : > { %3243 = vmatpush3.bf16.msra.mxu0 %v3240_v45  ;;  %v3216_v32 = vpack.c.bf16 %v700_v30, %v699_v29  ;;  %v709_v45 = vld [vmem:[#allocation3 + $0x2f0] sm:$0xff] }
  0xab   : > { %3245 = vmatprep.subr.bf16.mxu0 %v3244_v47 }
  0xae   : > { %3247 = vmatpush3.bf16.msra.mxu0 %v3244_v47  ;;  %v3236_v47 = vpack.c.bf16 %v710_v46, %v709_v45  ;;  %v995_v46 = vld [vmem:[#allocation3 + $0x410] sm:$0xff] }
  0xaf   : > { %3249 = vmatprep.subr.bf16.mxu0 %v3248_v50 }
  0xb2   : > { %3251 = vmatpush3.bf16.msra.mxu0 %v3248_v50  ;;  %v835_v50 = vld [vmem:[#allocation3 + $0x3d8] sm:$0xff] }
  0xb3   : > { %3253 = vmatprep.subr.bf16.mxu0 %v3252_v53  ;;  %v3260_v51 = vpack.c.bf16 %v835_v50, %v834_v49  ;;  %v997_v50 = vld [vmem:[#allocation3 + $0x420] sm:$0xff] }
  0xb6   : > { %3255 = vmatpush3.bf16.msra.mxu0 %v3252_v53  ;;  %v837_v53 = vld [vmem:[#allocation3 + $0x3e8] sm:$0xff] }
  0xb7   : > { %3257 = vmatprep.subr.bf16.mxu0 %v3256_v56  ;;  %v3264_v54 = vpack.c.bf16 %v837_v53, %v836_v52 }
  0xba   : > { %3259 = vmatpush3.bf16.msra.mxu0 %v3256_v56  ;;  %v839_v56 = vld [vmem:[#allocation3 + $0x3f8] sm:$0xff] }
  0xbb   : > { %3261 = vmatprep.subr.bf16.mxu0 %v3260_v51 }
  0xbe   : > { %3263 = vmatpush3.bf16.msra.mxu0 %v3260_v51  ;;  %v998_v51 = vld [vmem:[#allocation3 + $0x428] sm:$0xff] }
  0xbf   : > { %3265 = vmatprep.subr.bf16.mxu0 %v3264_v54  ;;  %v3312_v53 = vpack.c.bf16 %v998_v51, %v997_v50  ;;  %v1111_v50 = vld [vmem:[#allocation3 + $0x4c0] sm:$0xff]  ;;  %v1112_v51 = vld [vmem:[#allocation3 + $0x4c8] sm:$0xff] }
  0xc2   : > { %3267 = vmatpush3.bf16.msra.mxu0 %v3264_v54  ;;  %v999_v54 = vld [vmem:[#allocation3 + $0x430] sm:$0xff] }
 0x17c   : > { %v2522_v58 = vpop.f32.mrb[0].mxu0 }
 0x17d   : > { %v499_v59 = vadd.f32 %v2522_v58, %v2084_v57  ;;  %v480_v60 = vpop.f32.mrb[1].mxu0  ;;  %v805_v58 = vld [vmem:[#allocation3 + $0x300] sm:$0xff] }
 0x17e   : > { %v498_v61 = vadd.f32 %v2084_v57, %v480_v60  ;;  %v3268_v57 = vpack.c.bf16 %v839_v56, %v838_v55  ;;  %v1000_v55 = vld [vmem:[#allocation3 + $0x438] sm:$0xff] }
 0x17f   : > { %v3877_v0 = vmax.f32 %v499_v59, 0.0  ;;  %v806_v59 = vld [vmem:[#allocation3 + $0x308] sm:$0xff]  ;;  %v3316_v56 = vpack.c.bf16 %v1000_v55, %v999_v54  ;;  %v1114_v54 = vld [vmem:[#allocation3 + $0x4d8] sm:$0xff] }
 0x180   : > { %v3879_v1 = vmax.f32 %v498_v61, 0.0  ;;  %3269 = vmatprep.subr.bf16.mxu0 %v3268_v57  ;;  %v3272_v60 = vpack.c.bf16 %v806_v59, %v805_v58  ;;  %v1122_v61 = vld [vmem:[#allocation3 + $0x500] sm:$0xff]  ;;  %v1002_v58 = vld [vmem:[#allocation3 + $0x448] sm:$0xff] }
 0x181   : > { %503 = vst [vmem:[#allocation2 + $0x9] sm:$0xff] %v3877_v0  ;;  %3271 = vmatpush3.bf16.msra.mxu0 %v3268_v57  ;;  %v1001_v57 = vld [vmem:[#allocation3 + $0x440] sm:$0xff] }
 0x182   : > { %502 = vst [vmem:[#allocation2 + $0x1] sm:$0xff] %v3879_v1  ;;  %2555 = vmatprep.mubr.f32.mxu1 %v3879_v1  ;;  %3273 = vmatprep.subr.bf16.mxu0 %v3272_v60  ;;  %v3320_v59 = vpack.c.bf16 %v1002_v58, %v1001_v57  ;;  %v1116_v57 = vld [vmem:[#allocation3 + $0x4e8] sm:$0xff] }
 0x183   : > { %2556 = vmatmul.mubr.f32.vlgmr.msra.gmra.mrb[0].mxu1 %v3877_v0 }
 0x184   : > { %3179 = vmatpush3.bf16.msra.mxu1 %v3176_v41  ;;  %v3228_v41 = vpack.c.bf16 %v706_v40, %v705_v39  ;;  %v819_v40 = vld [vmem:[#allocation3 + $0x370] sm:$0xff] }
 0x185   : > { %3181 = vmatprep.subr.bf16.mxu1 %v3180_v2 }
 0x188   : > { %3183 = vmatpush3.bf16.msra.mxu1 %v3180_v2  ;;  %v693_v48 = vld [vmem:[#allocation2 + $0xa] sm:$0xff]  ;;  %v3336_v2 = vpack.c.bf16 %v1123_v62, %v1122_v61 }
 0x189   : > { %v504_v8 = vld [vmem:[#allocation2] sm:$0xff]  ;;  %3185 = vmatprep.subr.bf16.mxu1 %v3184_v5  ;;  %v505_v28 = vld [vmem:[#allocation2 + $0x8] sm:$0xff]  ;;  %v1004_v61 = vld [vmem:[#allocation3 + $0x458] sm:$0xff] }
 0x18a   : > { %2590 = vmatprep.mubr.f32.mxu1 %v504_v8  ;;  %v692_v31 = vld [vmem:[#allocation2 + $0x2] sm:$0xff] }
 0x18b   : > { %v1128_v8 = vld [vmem:[#allocation3 + $0x530] sm:$0xff] }
 0x18c   : > { %3187 = vmatpush3.bf16.msra.mxu1 %v3184_v5  ;;  %v1126_v5 = vld [vmem:[#allocation3 + $0x520] sm:$0xff] }
 0x18d   : > { %3189 = vmatprep.subr.bf16.mxu1 %v3188_v9  ;;  %v3344_v7 = vpack.c.bf16 %v1127_v6, %v1126_v5  ;;  %v1008_v5 = vld [vmem:[#allocation3 + $0x478] sm:$0xff] }
 0x190   : > { %3191 = vmatpush3.bf16.msra.mxu1 %v3188_v9  ;;  %v1129_v9 = vld [vmem:[#allocation3 + $0x538] sm:$0xff] }
 0x191   : > { %3193 = vmatprep.subr.bf16.mxu1 %v3192_v12  ;;  %v3348_v10 = vpack.c.bf16 %v1129_v9, %v1128_v8  ;;  %v1132_v8 = vld [vmem:[#allocation3 + $0x550] sm:$0xff]  ;;  %v1133_v9 = vld [vmem:[#allocation3 + $0x558] sm:$0xff] }
 0x194   : > { %3195 = vmatpush3.bf16.msra.mxu1 %v3192_v12  ;;  %v1131_v12 = vld [vmem:[#allocation3 + $0x548] sm:$0xff] }
 0x195   : > { %3197 = vmatprep.subr.bf16.mxu1 %v3196_v15  ;;  %v3352_v13 = vpack.c.bf16 %v1131_v12, %v1130_v11  ;;  %v1134_v11 = vld [vmem:[#allocation3 + $0x560] sm:$0xff]  ;;  %v1135_v12 = vld [vmem:[#allocation3 + $0x568] sm:$0xff] }
 0x198   : > { %3199 = vmatpush3.bf16.msra.mxu1 %v3196_v15 }
 0x199   : > { %3201 = vmatprep.subr.bf16.mxu1 %v3200_v18 }
 0x19c   : > { %3203 = vmatpush3.bf16.msra.mxu1 %v3200_v18 }
 0x19d   : > { %3205 = vmatprep.subr.bf16.mxu1 %v3204_v21 }
 0x1a0   : > { %3207 = vmatpush3.bf16.msra.mxu1 %v3204_v21 }
 0x1a1   : > { %3209 = vmatprep.subr.bf16.mxu1 %v3208_v24 }
 0x1a3   : > { %2591 = vmatmul.mubr.f32.vlgmr.msra.gmra.mrb[0].mxu1 %v505_v28  ;;  %v812_v28 = vld [vmem:[#allocation3 + $0x338] sm:$0xff] }
 0x1a4   : > { %3211 = vmatpush3.bf16.msra.mxu1 %v3208_v24  ;;  %2625 = vmatprep.mubr.f32.mxu1 %v692_v31  ;;  %v809_v24 = vld [vmem:[#allocation3 + $0x320] sm:$0xff] }
 0x1a5   : > { %3213 = vmatprep.subr.bf16.mxu1 %v3212_v27  ;;  %v3280_v26 = vpack.c.bf16 %v810_v25, %v809_v24  ;;  %v813_v31 = vld [vmem:[#allocation3 + $0x340] sm:$0xff]  ;;  %v1423_v24 = vld [vmem:[#allocation3 + $0x698] sm:$0xff] }
 0x1a8   : > { %3215 = vmatpush3.bf16.msra.mxu1 %v3212_v27  ;;  %v811_v27 = vld [vmem:[#allocation3 + $0x330] sm:$0xff] }
 0x1a9   : > { %3217 = vmatprep.subr.bf16.mxu1 %v3216_v32  ;;  %v3284_v30 = vpack.c.bf16 %v812_v28, %v811_v27  ;;  %v1425_v27 = vld [vmem:[#allocation3 + $0x6a8] sm:$0xff] }
 0x1ac   : > { %3219 = vmatpush3.bf16.msra.mxu1 %v3216_v32  ;;  %v814_v32 = vld [vmem:[#allocation3 + $0x348] sm:$0xff] }
 0x1ad   : > { %3221 = vmatprep.subr.bf16.mxu1 %v3220_v35  ;;  %v3288_v33 = vpack.c.bf16 %v814_v32, %v813_v31  ;;  %v1428_v32 = vld [vmem:[#allocation3 + $0x6c0] sm:$0xff] }
 0x1b0   : > { %3223 = vmatpush3.bf16.msra.mxu1 %v3220_v35  ;;  %v816_v35 = vld [vmem:[#allocation3 + $0x358] sm:$0xff] }
 0x1b1   : > { %3225 = vmatprep.subr.bf16.mxu1 %v3224_v38  ;;  %v3292_v36 = vpack.c.bf16 %v816_v35, %v815_v34  ;;  %v2086_v35 = vld [vmem:[#allocation5 + $0x2] ss:$0 sm:$0xff] }
 0x1b4   : > { %3227 = vmatpush3.bf16.msra.mxu1 %v3224_v38  ;;  %v818_v38 = vld [vmem:[#allocation3 + $0x368] sm:$0xff] }
 0x1b5   : > { %3229 = vmatprep.subr.bf16.mxu1 %v3228_v41  ;;  %v3296_v39 = vpack.c.bf16 %v818_v38, %v817_v37 }
 0x1b8   : > { %3231 = vmatpush3.bf16.msra.mxu1 %v3228_v41  ;;  %v820_v41 = vld [vmem:[#allocation3 + $0x378] sm:$0xff] }
 0x1b9   : > { %3233 = vmatprep.subr.bf16.mxu1 %v3232_v44  ;;  %v3300_v42 = vpack.c.bf16 %v820_v41, %v819_v40  ;;  %v1105_v40 = vld [vmem:[#allocation3 + $0x490] sm:$0xff]  ;;  %v1106_v41 = vld [vmem:[#allocation3 + $0x498] sm:$0xff] }
 0x1bc   : > { %3235 = vmatpush3.bf16.msra.mxu1 %v3232_v44  ;;  %v994_v44 = vld [vmem:[#allocation3 + $0x408] sm:$0xff] }
 0x1bd   : > { %3237 = vmatprep.subr.bf16.mxu1 %v3236_v47  ;;  %v3304_v45 = vpack.c.bf16 %v994_v44, %v993_v43  ;;  %v3372_v44 = vpack.c.bf16 %v1106_v41, %v1105_v40  ;;  %v1719_v40 = vld [vmem:[#allocation3 + $0x808] sm:$0xff]  ;;  %v1720_v41 = vld [vmem:[#allocation3 + $0x810] sm:$0xff] }
 0x1c0   : > { %3239 = vmatpush3.bf16.msra.mxu1 %v3236_v47  ;;  %v996_v47 = vld [vmem:[#allocation3 + $0x418] sm:$0xff] }
 0x1c1   : > { %3337 = vmatprep.subr.bf16.mxu1 %v3336_v2 }
 0x1c3   : > { %2626 = vmatmul.mubr.f32.vlgmr.msra.gmra.mrb[0].mxu1 %v693_v48  ;;  %v3308_v48 = vpack.c.bf16 %v996_v47, %v995_v46  ;;  %v1108_v46 = vld [vmem:[#allocation3 + $0x4a8] sm:$0xff] }
 0x1c4   : > { %3339 = vmatpush3.bf16.msra.mxu1 %v3336_v2  ;;  %v1006_v2 = vld [vmem:[#allocation3 + $0x468] sm:$0xff] }
 0x1c5   : > { %3341 = vmatprep.subr.bf16.mxu1 %v3340_v4  ;;  %v3328_v3 = vpack.c.bf16 %v1006_v2, %v1005_v63  ;;  %v1292_v63 = vld [vmem:[#allocation3 + $0x588] sm:$0xff] }
 0x1c8   : > { %3343 = vmatpush3.bf16.msra.mxu1 %v3340_v4  ;;  %v1007_v4 = vld [vmem:[#allocation3 + $0x470] sm:$0xff] }
 0x1c9   : > { %3345 = vmatprep.subr.bf16.mxu1 %v3344_v7  ;;  %v3332_v6 = vpack.c.bf16 %v1008_v5, %v1007_v4  ;;  %v1294_v4 = vld [vmem:[#allocation3 + $0x598] sm:$0xff] }
 0x1cc   : > { %3347 = vmatpush3.bf16.msra.mxu1 %v3344_v7 }
 0x1cd   : > { %3349 = vmatprep.subr.bf16.mxu1 %v3348_v10 }
 0x1d0   : > { %3351 = vmatpush3.bf16.msra.mxu1 %v3348_v10  ;;  %v3356_v10 = vpack.c.bf16 %v1133_v9, %v1132_v8  ;;  %v1296_v8 = vld [vmem:[#allocation3 + $0x5a8] sm:$0xff] }
 0x1d1   : > { %3353 = vmatprep.subr.bf16.mxu1 %v3352_v13 }
 0x1d4   : > { %3355 = vmatpush3.bf16.msra.mxu1 %v3352_v13  ;;  %v3360_v13 = vpack.c.bf16 %v1135_v12, %v1134_v11  ;;  %v1297_v11 = vld [vmem:[#allocation3 + $0x5b0] sm:$0xff]  ;;  %v1298_v12 = vld [vmem:[#allocation3 + $0x5b8] sm:$0xff] }
 0x1d5   : > { %3357 = vmatprep.subr.bf16.mxu1 %v3356_v10 }
 0x1d8   : > { %3359 = vmatpush3.bf16.msra.mxu1 %v3356_v10 }
 0x1d9   : > { %3361 = vmatprep.subr.bf16.mxu1 %v3360_v13 }
 0x1dc   : > { %3363 = vmatpush3.bf16.msra.mxu1 %v3360_v13  ;;  %v3412_v13 = vpack.c.bf16 %v1298_v12, %v1297_v11  ;;  %v1411_v12 = vld [vmem:[#allocation3 + $0x650] sm:$0xff] }
 0x296   : > { %v2627_v15 = vpop.f32.mrb[0].mxu1 }
 0x297   : > { %v797_v16 = vadd.f32 %v2627_v15, %v2085_v14  ;;  %v777_v17 = vpop.f32.mrb[1].mxu1  ;;  %v1137_v15 = vld [vmem:[#allocation3 + $0x578] sm:$0xff] }
 0x298   : > { %v796_v18 = vadd.f32 %v2085_v14, %v777_v17  ;;  %v1136_v14 = vld [vmem:[#allocation3 + $0x570] sm:$0xff]  ;;  %v1103_v17 = vld [vmem:[#allocation3 + $0x480] sm:$0xff] }
 0x299   : > { %v799_v21 = vmax.f32 %v797_v16, 0.0  ;;  %v3364_v16 = vpack.c.bf16 %v1137_v15, %v1136_v14  ;;  %v1299_v14 = vld [vmem:[#allocation3 + $0x5c0] sm:$0xff]  ;;  %v1300_v15 = vld [vmem:[#allocation3 + $0x5c8] sm:$0xff] }
 0x29a   : > { %v798_v22 = vmax.f32 %v796_v18, 0.0  ;;  %v1104_v18 = vld [vmem:[#allocation3 + $0x488] sm:$0xff] }
 0x29b   : > { %801 = vst [vmem:[#allocation2 + $0x9] sm:$0xff] %v799_v21  ;;  %3365 = vmatprep.subr.bf16.mxu1 %v3364_v16  ;;  %v3368_v19 = vpack.c.bf16 %v1104_v18, %v1103_v17  ;;  %v1301_v17 = vld [vmem:[#allocation3 + $0x5d0] sm:$0xff]  ;;  %v1302_v18 = vld [vmem:[#allocation3 + $0x5d8] sm:$0xff] }
 0x29c   : > { %800 = vst [vmem:[#allocation2 + $0x1] sm:$0xff] %v798_v22  ;;  %2660 = vmatprep.mubr.f32.mxu0 %v798_v22  ;;  %3367 = vmatpush3.bf16.msra.mxu1 %v3364_v16  ;;  %v1422_v22 = vld [vmem:[#allocation3 + $0x690] sm:$0xff]  ;;  %v3416_v16 = vpack.c.bf16 %v1300_v15, %v1299_v14  ;;  %v1413_v15 = vld [vmem:[#allocation3 + $0x660] sm:$0xff] }
 0x29d   : > { %2661 = vmatmul.mubr.f32.vlgmr.msra.gmra.mrb[2].mxu0 %v799_v21  ;;  %3369 = vmatprep.subr.bf16.mxu1 %v3368_v19  ;;  %v1421_v21 = vld [vmem:[#allocation3 + $0x688] sm:$0xff]  ;;  %v3436_v25 = vpack.c.bf16 %v1423_v24, %v1422_v22  ;;  %v1306_v24 = vld [vmem:[#allocation3 + $0x5f8] sm:$0xff] }
 0x29e   : > { %3275 = vmatpush3.bf16.msra.mxu0 %v3272_v60  ;;  %v1003_v60 = vld [vmem:[#allocation3 + $0x450] sm:$0xff] }
 0x29f   : > { %3277 = vmatprep.subr.bf16.mxu0 %v3276_v23  ;;  %v3324_v62 = vpack.c.bf16 %v1004_v61, %v1003_v60  ;;  %v1118_v60 = vld [vmem:[#allocation3 + $0x4f8] sm:$0xff] }
 0x2a2   : > { %3279 = vmatpush3.bf16.msra.mxu0 %v3276_v23  ;;  %v991_v7 = vld [vmem:[#allocation2 + $0xa] sm:$0xff]  ;;  %v3432_v23 = vpack.c.bf16 %v1421_v21, %v1420_v20  ;;  %v1303_v20 = vld [vmem:[#allocation3 + $0x5e0] sm:$0xff]  ;;  %v1304_v21 = vld [vmem:[#allocation3 + $0x5e8] sm:$0xff] }
 0x2a3   : > { %v802_v29 = vld [vmem:[#allocation2] sm:$0xff]  ;;  %3281 = vmatprep.subr.bf16.mxu0 %v3280_v26  ;;  %v803_v49 = vld [vmem:[#allocation2 + $0x8] sm:$0xff]  ;;  %v3424_v22 = vpack.c.bf16 %v1304_v21, %v1303_v20  ;;  %v1589_v21 = vld [vmem:[#allocation3 + $0x700] sm:$0xff] }
 0x2a4   : > { %2695 = vmatprep.mubr.f32.mxu0 %v802_v29  ;;  %v990_v52 = vld [vmem:[#allocation2 + $0x2] sm:$0xff] }
 0x2a5   : > { %v1426_v29 = vld [vmem:[#allocation3 + $0x6b0] sm:$0xff] }
 0x2a6   : > { %3283 = vmatpush3.bf16.msra.mxu0 %v3280_v26  ;;  %v1424_v26 = vld [vmem:[#allocation3 + $0x6a0] sm:$0xff] }
 0x2a7   : > { %3285 = vmatprep.subr.bf16.mxu0 %v3284_v30  ;;  %v3440_v28 = vpack.c.bf16 %v1425_v27, %v1424_v26  ;;  %v1430_v27 = vld [vmem:[#allocation3 + $0x6d0] sm:$0xff] }
 0x2aa   : > { %3287 = vmatpush3.bf16.msra.mxu0 %v3284_v30  ;;  %v1427_v30 = vld [vmem:[#allocation3 + $0x6b8] sm:$0xff] }
 0x2ab   : > { %3289 = vmatprep.subr.bf16.mxu0 %v3288_v33  ;;  %v3444_v31 = vpack.c.bf16 %v1427_v30, %v1426_v29  ;;  %v1432_v30 = vld [vmem:[#allocation3 + $0x6e0] sm:$0xff] }
 0x2ae   : > { %3291 = vmatpush3.bf16.msra.mxu0 %v3288_v33  ;;  %v1429_v33 = vld [vmem:[#allocation3 + $0x6c8] sm:$0xff] }
 0x2af   : > { %3293 = vmatprep.subr.bf16.mxu0 %v3292_v36  ;;  %v3448_v34 = vpack.c.bf16 %v1429_v33, %v1428_v32  ;;  %v1434_v33 = vld [vmem:[#allocation3 + $0x6f0] sm:$0xff] }
 0x2b2   : > { %3295 = vmatpush3.bf16.msra.mxu0 %v3292_v36 }
 0x2b3   : > { %3297 = vmatprep.subr.bf16.mxu0 %v3296_v39 }
 0x2b6   : > { %3299 = vmatpush3.bf16.msra.mxu0 %v3296_v39 }
 0x2b7   : > { %3301 = vmatprep.subr.bf16.mxu0 %v3300_v42 }
 0x2ba   : > { %3303 = vmatpush3.bf16.msra.mxu0 %v3300_v42 }
 0x2bb   : > { %3305 = vmatprep.subr.bf16.mxu0 %v3304_v45 }
 0x2bd   : > { %2696 = vmatmul.mubr.f32.vlgmr.msra.gmra.mrb[2].mxu0 %v803_v49 }
 0x2be   : > { %3307 = vmatpush3.bf16.msra.mxu0 %v3304_v45  ;;  %2730 = vmatprep.mubr.f32.mxu0 %v990_v52  ;;  %v1107_v45 = vld [vmem:[#allocation3 + $0x4a0] sm:$0xff]  ;;  %v3384_v52 = vpack.c.bf16 %v1112_v51, %v1111_v50 }
 0x2bf   : > { %3309 = vmatprep.subr.bf16.mxu0 %v3308_v48  ;;  %v3376_v47 = vpack.c.bf16 %v1108_v46, %v1107_v45  ;;  %v1721_v45 = vld [vmem:[#allocation3 + $0x818] sm:$0xff]  ;;  %v1726_v51 = vld [vmem:[#allocation3 + $0x840] sm:$0xff] }
 0x2c0   : > { %v3532_v46 = vpack.c.bf16 %v1721_v45, %v1720_v41  ;;  %v1601_v41 = vld [vmem:[#allocation3 + $0x760] sm:$0xff] }
 0x2c2   : > { %3311 = vmatpush3.bf16.msra.mxu0 %v3308_v48  ;;  %v1109_v48 = vld [vmem:[#allocation3 + $0x4b0] sm:$0xff] }
 0x2c3   : > { %3313 = vmatprep.subr.bf16.mxu0 %v3312_v53 }
 0x2c6   : > { %3315 = vmatpush3.bf16.msra.mxu0 %v3312_v53  ;;  %v1113_v53 = vld [vmem:[#allocation3 + $0x4d0] sm:$0xff] }
 0x2c7   : > { %3317 = vmatprep.subr.bf16.mxu0 %v3316_v56  ;;  %v3388_v55 = vpack.c.bf16 %v1114_v54, %v1113_v53  ;;  %v2087_v54 = vld [vmem:[#allocation5 + $0x3] ss:$0 sm:$0xff] }
 0x2ca   : > { %3319 = vmatpush3.bf16.msra.mxu0 %v3316_v56  ;;  %v1115_v56 = vld [vmem:[#allocation3 + $0x4e0] sm:$0xff] }
 0x2cb   : > { %3321 = vmatprep.subr.bf16.mxu0 %v3320_v59  ;;  %v3392_v58 = vpack.c.bf16 %v1116_v57, %v1115_v56 }
 0x2ce   : > { %3323 = vmatpush3.bf16.msra.mxu0 %v3320_v59  ;;  %v1117_v59 = vld [vmem:[#allocation3 + $0x4f0] sm:$0xff] }
 0x2cf   : > { %3325 = vmatprep.subr.bf16.mxu0 %v3324_v62  ;;  %v3396_v61 = vpack.c.bf16 %v1118_v60, %v1117_v59  ;;  %v1403_v59 = vld [vmem:[#allocation3 + $0x610] sm:$0xff]  ;;  %v1404_v60 = vld [vmem:[#allocation3 + $0x618] sm:$0xff] }
 0x2d2   : > { %3327 = vmatpush3.bf16.msra.mxu0 %v3324_v62  ;;  %v1291_v62 = vld [vmem:[#allocation3 + $0x580] sm:$0xff] }
 0x2d3   : > { %3329 = vmatprep.subr.bf16.mxu0 %v3328_v3  ;;  %v3400_v2 = vpack.c.bf16 %v1292_v63, %v1291_v62  ;;  %v3468_v63 = vpack.c.bf16 %v1404_v60, %v1403_v59  ;;  %v2088_v60 = vld [vmem:[#allocation5 + $0x4] ss:$0 sm:$0xff] }
 0x2d6   : > { %3331 = vmatpush3.bf16.msra.mxu0 %v3328_v3  ;;  %v1293_v3 = vld [vmem:[#allocation3 + $0x590] sm:$0xff] }
 0x2d7   : > { %3333 = vmatprep.subr.bf16.mxu0 %v3332_v6  ;;  %v3404_v5 = vpack.c.bf16 %v1294_v4, %v1293_v3  ;;  %v1406_v3 = vld [vmem:[#allocation3 + $0x628] sm:$0xff] }
 0x2da   : > { %3335 = vmatpush3.bf16.msra.mxu0 %v3332_v6 }
 0x2db   : > { %3433 = vmatprep.subr.bf16.mxu0 %v3432_v23 }
 0x2dd   : > { %2731 = vmatmul.mubr.f32.vlgmr.msra.gmra.mrb[2].mxu0 %v991_v7  ;;  %v1295_v7 = vld [vmem:[#allocation3 + $0x5a0] sm:$0xff] }
 0x2de   : > { %3435 = vmatpush3.bf16.msra.mxu0 %v3432_v23  ;;  %v3408_v10 = vpack.c.bf16 %v1296_v8, %v1295_v7  ;;  %v1305_v23 = vld [vmem:[#allocation3 + $0x5f0] sm:$0xff] }
 0x2df   : > { %3437 = vmatprep.subr.bf16.mxu0 %v3436_v25 }
 0x2e2   : > { %3439 = vmatpush3.bf16.msra.mxu0 %v3436_v25  ;;  %v3428_v25 = vpack.c.bf16 %v1306_v24, %v1305_v23  ;;  %v1591_v24 = vld [vmem:[#allocation3 + $0x710] sm:$0xff] }
 0x2e3   : > { %3441 = vmatprep.subr.bf16.mxu0 %v3440_v28 }
 0x2e6   : > { %3443 = vmatpush3.bf16.msra.mxu0 %v3440_v28  ;;  %v1431_v28 = vld [vmem:[#allocation3 + $0x6d8] sm:$0xff] }
 0x2e7   : > { %3445 = vmatprep.subr.bf16.mxu0 %v3444_v31  ;;  %v3452_v29 = vpack.c.bf16 %v1431_v28, %v1430_v27  ;;  %v1593_v28 = vld [vmem:[#allocation3 + $0x720] sm:$0xff] }
 0x2ea   : > { %3447 = vmatpush3.bf16.msra.mxu0 %v3444_v31  ;;  %v1433_v31 = vld [vmem:[#allocation3 + $0x6e8] sm:$0xff] }
 0x2eb   : > { %3449 = vmatprep.subr.bf16.mxu0 %v3448_v34  ;;  %v3456_v32 = vpack.c.bf16 %v1433_v31, %v1432_v30 }
 0x2ee   : > { %3451 = vmatpush3.bf16.msra.mxu0 %v3448_v34  ;;  %v1435_v34 = vld [vmem:[#allocation3 + $0x6f8] sm:$0xff] }
 0x2ef   : > { %3453 = vmatprep.subr.bf16.mxu0 %v3452_v29 }
 0x2f2   : > { %3455 = vmatpush3.bf16.msra.mxu0 %v3452_v29  ;;  %v1594_v29 = vld [vmem:[#allocation3 + $0x728] sm:$0xff] }
 0x2f3   : > { %3457 = vmatprep.subr.bf16.mxu0 %v3456_v32  ;;  %v3504_v31 = vpack.c.bf16 %v1594_v29, %v1593_v28  ;;  %v1889_v28 = vld [vmem:[#allocation3 + $0x890] sm:$0xff]  ;;  %v1890_v29 = vld [vmem:[#allocation3 + $0x898] sm:$0xff] }
 0x2f6   : > { %3459 = vmatpush3.bf16.msra.mxu0 %v3456_v32  ;;  %v1595_v32 = vld [vmem:[#allocation3 + $0x730] sm:$0xff] }
 0x3b0   : > { %v2732_v36 = vpop.f32.mrb[2].mxu0 }
 0x3b1   : > { %v1095_v37 = vadd.f32 %v2732_v36, %v2086_v35  ;;  %v1075_v38 = vpop.f32.mrb[3].mxu0  ;;  %v1401_v36 = vld [vmem:[#allocation3 + $0x600] sm:$0xff] }
 0x3b2   : > { %v1094_v39 = vadd.f32 %v2086_v35, %v1075_v38  ;;  %v3460_v35 = vpack.c.bf16 %v1435_v34, %v1434_v33  ;;  %v1596_v33 = vld [vmem:[#allocation3 + $0x738] sm:$0xff] }
 0x3b3   : > { %v3886_v42 = vadd.f32 %v1095_v37, %v3877_v0  ;;  %v1110_v0 = vld [vmem:[#allocation3 + $0x4b8] sm:$0xff]  ;;  %v1402_v37 = vld [vmem:[#allocation3 + $0x608] sm:$0xff]  ;;  %v3508_v34 = vpack.c.bf16 %v1596_v33, %v1595_v32  ;;  %v1891_v32 = vld [vmem:[#allocation3 + $0x8a0] sm:$0xff] }
 0x3b4   : > { %v3889_v43 = vadd.f32 %v1094_v39, %v3879_v1  ;;  %v3380_v1 = vpack.c.bf16 %v1110_v0, %v1109_v48  ;;  %3461 = vmatprep.subr.bf16.mxu0 %v3460_v35  ;;  %v3464_v38 = vpack.c.bf16 %v1402_v37, %v1401_v36  ;;  %v1718_v39 = vld [vmem:[#allocation3 + $0x800] sm:$0xff]  ;;  %v1723_v48 = vld [vmem:[#allocation3 + $0x828] sm:$0xff] }
 0x3b5   : > { %1099 = vst [vmem:[#allocation2 + $0x9] sm:$0xff] %v3886_v42  ;;  %3463 = vmatpush3.bf16.msra.mxu0 %v3460_v35  ;;  %v1597_v35 = vld [vmem:[#allocation3 + $0x740] sm:$0xff]  ;;  %v1598_v36 = vld [vmem:[#allocation3 + $0x748] sm:$0xff] }
 0x3b6   : > { %1098 = vst [vmem:[#allocation2 + $0x1] sm:$0xff] %v3889_v43  ;;  %2765 = vmatprep.mubr.f32.mxu1 %v3889_v43  ;;  %3465 = vmatprep.subr.bf16.mxu0 %v3464_v38  ;;  %v3512_v37 = vpack.c.bf16 %v1598_v36, %v1597_v35  ;;  %v1892_v33 = vld [vmem:[#allocation3 + $0x8a8] sm:$0xff]  ;;  %v1893_v36 = vld [vmem:[#allocation3 + $0x8b0] sm:$0xff] }
 0x3b7   : > { %2766 = vmatmul.mubr.f32.vlgmr.msra.gmra.mrb[2].mxu1 %v3886_v42  ;;  %v3600_v35 = vpack.c.bf16 %v1892_v33, %v1891_v32 }
 0x3b8   : > { %3371 = vmatpush3.bf16.msra.mxu1 %v3368_v19  ;;  %v3420_v19 = vpack.c.bf16 %v1302_v18, %v1301_v17  ;;  %v1415_v18 = vld [vmem:[#allocation3 + $0x670] sm:$0xff] }
 0x3b9   : > { %3373 = vmatprep.subr.bf16.mxu1 %v3372_v44 }
 0x3bc   : > { %3375 = vmatpush3.bf16.msra.mxu1 %v3372_v44  ;;  %v1289_v26 = vld [vmem:[#allocation2 + $0xa] sm:$0xff]  ;;  %v3528_v44 = vpack.c.bf16 %v1719_v40, %v1718_v39 }
 0x3bd   : > { %v1100_v49 = vld [vmem:[#allocation2] sm:$0xff]  ;;  %3377 = vmatprep.subr.bf16.mxu1 %v3376_v47  ;;  %v1101_v6 = vld [vmem:[#allocation2 + $0x8] sm:$0xff]  ;;  %v1600_v39 = vld [vmem:[#allocation3 + $0x758] sm:$0xff] }
 0x3be   : > { %2800 = vmatprep.mubr.f32.mxu1 %v1100_v49  ;;  %v1288_v9 = vld [vmem:[#allocation2 + $0x2] sm:$0xff] }
 0x3bf   : > { %v1724_v49 = vld [vmem:[#allocation3 + $0x830] sm:$0xff] }
 0x3c0   : > { %3379 = vmatpush3.bf16.msra.mxu1 %v3376_v47  ;;  %v1722_v47 = vld [vmem:[#allocation3 + $0x820] sm:$0xff] }
 0x3c1   : > { %3381 = vmatprep.subr.bf16.mxu1 %v3380_v1  ;;  %v3536_v0 = vpack.c.bf16 %v1723_v48, %v1722_v47  ;;  %v1604_v47 = vld [vmem:[#allocation3 + $0x778] sm:$0xff] }
 0x3c4   : > { %3383 = vmatpush3.bf16.msra.mxu1 %v3380_v1  ;;  %v1725_v1 = vld [vmem:[#allocation3 + $0x838] sm:$0xff] }
 0x3c5   : > { %3385 = vmatprep.subr.bf16.mxu1 %v3384_v52  ;;  %v3540_v50 = vpack.c.bf16 %v1725_v1, %v1724_v49  ;;  %v1728_v49 = vld [vmem:[#allocation3 + $0x850] sm:$0xff]  ;;  %v1729_v1 = vld [vmem:[#allocation3 + $0x858] sm:$0xff] }
 0x3c8   : > { %3387 = vmatpush3.bf16.msra.mxu1 %v3384_v52  ;;  %v1727_v52 = vld [vmem:[#allocation3 + $0x848] sm:$0xff] }
 0x3c9   : > { %3389 = vmatprep.subr.bf16.mxu1 %v3388_v55  ;;  %v3544_v53 = vpack.c.bf16 %v1727_v52, %v1726_v51  ;;  %v1730_v51 = vld [vmem:[#allocation3 + $0x860] sm:$0xff]  ;;  %v1731_v52 = vld [vmem:[#allocation3 + $0x868] sm:$0xff] }
 0x3cc   : > { %3391 = vmatpush3.bf16.msra.mxu1 %v3388_v55 }
 0x3cd   : > { %3393 = vmatprep.subr.bf16.mxu1 %v3392_v58 }
 0x3d0   : > { %3395 = vmatpush3.bf16.msra.mxu1 %v3392_v58 }
 0x3d1   : > { %3397 = vmatprep.subr.bf16.mxu1 %v3396_v61 }
 0x3d4   : > { %3399 = vmatpush3.bf16.msra.mxu1 %v3396_v61 }
 0x3d5   : > { %3401 = vmatprep.subr.bf16.mxu1 %v3400_v2 }
 0x3d7   : > { %2801 = vmatmul.mubr.f32.vlgmr.msra.gmra.mrb[2].mxu1 %v1101_v6  ;;  %v1408_v6 = vld [vmem:[#allocation3 + $0x638] sm:$0xff] }
 0x3d8   : > { %3403 = vmatpush3.bf16.msra.mxu1 %v3400_v2  ;;  %2835 = vmatprep.mubr.f32.mxu1 %v1288_v9  ;;  %v1405_v2 = vld [vmem:[#allocation3 + $0x620] sm:$0xff] }
 0x3d9   : > { %3405 = vmatprep.subr.bf16.mxu1 %v3404_v5  ;;  %v3472_v4 = vpack.c.bf16 %v1406_v3, %v1405_v2  ;;  %v1409_v9 = vld [vmem:[#allocation3 + $0x640] sm:$0xff]  ;;  %v1701_v3 = vld [vmem:[#allocation3 + $0x790] sm:$0xff] }
 0x3dc   : > { %3407 = vmatpush3.bf16.msra.mxu1 %v3404_v5  ;;  %v1407_v5 = vld [vmem:[#allocation3 + $0x630] sm:$0xff] }
 0x3dd   : > { %3409 = vmatprep.subr.bf16.mxu1 %v3408_v10  ;;  %v3476_v8 = vpack.c.bf16 %v1408_v6, %v1407_v5 }
 0x3e0   : > { %3411 = vmatpush3.bf16.msra.mxu1 %v3408_v10  ;;  %v1410_v10 = vld [vmem:[#allocation3 + $0x648] sm:$0xff] }
 0x3e1   : > { %3413 = vmatprep.subr.bf16.mxu1 %v3412_v13  ;;  %v3480_v11 = vpack.c.bf16 %v1410_v10, %v1409_v9  ;;  %v1704_v9 = vld [vmem:[#allocation3 + $0x7a8] sm:$0xff] }
 0x3e4   : > { %3415 = vmatpush3.bf16.msra.mxu1 %v3412_v13  ;;  %v1412_v13 = vld [vmem:[#allocation3 + $0x658] sm:$0xff] }
 0x3e5   : > { %3417 = vmatprep.subr.bf16.mxu1 %v3416_v16  ;;  %v3484_v14 = vpack.c.bf16 %v1412_v13, %v1411_v12  ;;  %v1706_v12 = vld [vmem:[#allocation3 + $0x7b8] sm:$0xff] }
 0x3e8   : > { %3419 = vmatpush3.bf16.msra.mxu1 %v3416_v16  ;;  %v1414_v16 = vld [vmem:[#allocation3 + $0x668] sm:$0xff] }
 0x3e9   : > { %3421 = vmatprep.subr.bf16.mxu1 %v3420_v19  ;;  %v3488_v17 = vpack.c.bf16 %v1414_v16, %v1413_v15  ;;  %v1708_v15 = vld [vmem:[#allocation3 + $0x7c8] sm:$0xff]  ;;  %v1709_v16 = vld [vmem:[#allocation3 + $0x7d0] sm:$0xff] }
 0x3ec   : > { %3423 = vmatpush3.bf16.msra.mxu1 %v3420_v19  ;;  %v1416_v19 = vld [vmem:[#allocation3 + $0x678] sm:$0xff] }
 0x3ed   : > { %3425 = vmatprep.subr.bf16.mxu1 %v3424_v22  ;;  %v3492_v20 = vpack.c.bf16 %v1416_v19, %v1415_v18  ;;  %v1711_v19 = vld [vmem:[#allocation3 + $0x7e0] sm:$0xff] }
 0x3f0   : > { %3427 = vmatpush3.bf16.msra.mxu1 %v3424_v22  ;;  %v1590_v22 = vld [vmem:[#allocation3 + $0x708] sm:$0xff] }
 0x3f1   : > { %3429 = vmatprep.subr.bf16.mxu1 %v3428_v25  ;;  %v3496_v23 = vpack.c.bf16 %v1590_v22, %v1589_v21  ;;  %v1713_v22 = vld [vmem:[#allocation3 + $0x7f0] sm:$0xff] }
 0x3f4   : > { %3431 = vmatpush3.bf16.msra.mxu1 %v3428_v25  ;;  %v1592_v25 = vld [vmem:[#allocation3 + $0x718] sm:$0xff] }
 0x3f5   : > { %3529 = vmatprep.subr.bf16.mxu1 %v3528_v44 }
 0x3f7   : > { %2836 = vmatmul.mubr.f32.vlgmr.msra.gmra.mrb[2].mxu1 %v1289_v26  ;;  %v3500_v26 = vpack.c.bf16 %v1592_v25, %v1591_v24  ;;  %v1887_v25 = vld [vmem:[#allocation3 + $0x880] sm:$0xff] }
 0x3f8   : > { %3531 = vmatpush3.bf16.msra.mxu1 %v3528_v44  ;;  %v1602_v44 = vld [vmem:[#allocation3 + $0x768] sm:$0xff] }
 0x3f9   : > { %3533 = vmatprep.subr.bf16.mxu1 %v3532_v46  ;;  %v3520_v45 = vpack.c.bf16 %v1602_v44, %v1601_v41  ;;  %v1897_v44 = vld [vmem:[#allocation3 + $0x8d0] sm:$0xff] }
 0x3fc   : > { %3535 = vmatpush3.bf16.msra.mxu1 %v3532_v46  ;;  %v1603_v46 = vld [vmem:[#allocation3 + $0x770] sm:$0xff] }
 0x3fd   : > { %3537 = vmatprep.subr.bf16.mxu1 %v3536_v0  ;;  %v3524_v48 = vpack.c.bf16 %v1604_v47, %v1603_v46  ;;  %v1899_v47 = vld [vmem:[#allocation3 + $0x8e0] sm:$0xff] }
 0x400   : > { %3539 = vmatpush3.bf16.msra.mxu1 %v3536_v0 }
 0x401   : > { %3541 = vmatprep.subr.bf16.mxu1 %v3540_v50 }
 0x404   : > { %3543 = vmatpush3.bf16.msra.mxu1 %v3540_v50  ;;  %v3548_v50 = vpack.c.bf16 %v1729_v1, %v1728_v49  ;;  %v1901_v49 = vld [vmem:[#allocation3 + $0x8f0] sm:$0xff]  ;;  %v1902_v1 = vld [vmem:[#allocation3 + $0x8f8] sm:$0xff] }
 0x405   : > { %3545 = vmatprep.subr.bf16.mxu1 %v3544_v53 }
 0x408   : > { %3547 = vmatpush3.bf16.msra.mxu1 %v3544_v53  ;;  %v3552_v53 = vpack.c.bf16 %v1731_v52, %v1730_v51  ;;  %v2089_v52 = vld [vmem:[#allocation5 + $0x5] ss:$0 sm:$0xff] }
 0x409   : > { %3549 = vmatprep.subr.bf16.mxu1 %v3548_v50 }
 0x40c   : > { %3551 = vmatpush3.bf16.msra.mxu1 %v3548_v50  ;;  %v3620_v50 = vpack.c.bf16 %v1902_v1, %v1901_v49 }
 0x40d   : > { %3553 = vmatprep.subr.bf16.mxu1 %v3552_v53 }
 0x410   : > { %3555 = vmatpush3.bf16.msra.mxu1 %v3552_v53 }
 0x4ca   : > { %v2837_v55 = vpop.f32.mrb[2].mxu1 }
 0x4cb   : > { %v1393_v56 = vadd.f32 %v2837_v55, %v2087_v54  ;;  %v1373_v57 = vpop.f32.mrb[3].mxu1  ;;  %v1733_v55 = vld [vmem:[#allocation3 + $0x878] sm:$0xff] }
 0x4cc   : > { %v1392_v58 = vadd.f32 %v2087_v54, %v1373_v57  ;;  %v1732_v54 = vld [vmem:[#allocation3 + $0x870] sm:$0xff]  ;;  %v1699_v57 = vld [vmem:[#allocation3 + $0x780] sm:$0xff] }
 0x4cd   : > { %v1395_v61 = vmax.f32 %v1393_v56, 0.0  ;;  %v3556_v56 = vpack.c.bf16 %v1733_v55, %v1732_v54 }
 0x4ce   : > { %v1394_v62 = vmax.f32 %v1392_v58, 0.0  ;;  %v1700_v58 = vld [vmem:[#allocation3 + $0x788] sm:$0xff] }
 0x4cf   : > { %1397 = vst [vmem:[#allocation2 + $0x9] sm:$0xff] %v1395_v61  ;;  %3557 = vmatprep.subr.bf16.mxu1 %v3556_v56  ;;  %v3560_v59 = vpack.c.bf16 %v1700_v58, %v1699_v57 }
 0x4d0   : > { %1396 = vst [vmem:[#allocation2 + $0x1] sm:$0xff] %v1394_v62  ;;  %2870 = vmatprep.mubr.f32.mxu0 %v1394_v62  ;;  %3559 = vmatpush3.bf16.msra.mxu1 %v3556_v56 }
 0x4d1   : > { %2871 = vmatmul.mubr.f32.vlgmr.msra.gmra.mrb[4].mxu0 %v1395_v61  ;;  %3561 = vmatprep.subr.bf16.mxu1 %v3560_v59 }
 0x4d2   : > { %3467 = vmatpush3.bf16.msra.mxu0 %v3464_v38  ;;  %v1599_v38 = vld [vmem:[#allocation3 + $0x750] sm:$0xff] }
 0x4d3   : > { %3469 = vmatprep.subr.bf16.mxu0 %v3468_v63  ;;  %v3516_v40 = vpack.c.bf16 %v1600_v39, %v1599_v38  ;;  %v1895_v39 = vld [vmem:[#allocation3 + $0x8c0] sm:$0xff] }
 0x4d6   : > { %3471 = vmatpush3.bf16.msra.mxu0 %v3468_v63  ;;  %v1587_v0 = vld [vmem:[#allocation2 + $0xa] sm:$0xff] }
 0x4d7   : > { %v1398_v7 = vld [vmem:[#allocation2] sm:$0xff]  ;;  %3473 = vmatprep.subr.bf16.mxu0 %v3472_v4  ;;  %v1399_v27 = vld [vmem:[#allocation2 + $0x8] sm:$0xff] }
 0x4d8   : > { %2905 = vmatprep.mubr.f32.mxu0 %v1398_v7  ;;  %v1586_v30 = vld [vmem:[#allocation2 + $0x2] sm:$0xff] }
 0x4da   : > { %3475 = vmatpush3.bf16.msra.mxu0 %v3472_v4  ;;  %v1702_v4 = vld [vmem:[#allocation3 + $0x798] sm:$0xff] }
 0x4db   : > { %3477 = vmatprep.subr.bf16.mxu0 %v3476_v8  ;;  %v3564_v7 = vpack.c.bf16 %v1702_v4, %v1701_v3 }
 0x4de   : > { %3479 = vmatpush3.bf16.msra.mxu0 %v3476_v8  ;;  %v1703_v8 = vld [vmem:[#allocation3 + $0x7a0] sm:$0xff] }
 0x4df   : > { %3481 = vmatprep.subr.bf16.mxu0 %v3480_v11  ;;  %v3568_v10 = vpack.c.bf16 %v1704_v9, %v1703_v8 }
 0x4e2   : > { %3483 = vmatpush3.bf16.msra.mxu0 %v3480_v11  ;;  %v1705_v11 = vld [vmem:[#allocation3 + $0x7b0] sm:$0xff] }
 0x4e3   : > { %3485 = vmatprep.subr.bf16.mxu0 %v3484_v14 }
 0x4e6   : > { %3487 = vmatpush3.bf16.msra.mxu0 %v3484_v14  ;;  %v3572_v14 = vpack.c.bf16 %v1706_v12, %v1705_v11 }
 0x4e7   : > { %3489 = vmatprep.subr.bf16.mxu0 %v3488_v17 }
 0x4ea   : > { %3491 = vmatpush3.bf16.msra.mxu0 %v3488_v17  ;;  %v1710_v17 = vld [vmem:[#allocation3 + $0x7d8] sm:$0xff] }
 0x4eb   : > { %3493 = vmatprep.subr.bf16.mxu0 %v3492_v20  ;;  %v3580_v18 = vpack.c.bf16 %v1710_v17, %v1709_v16 }
 0x4ee   : > { %3495 = vmatpush3.bf16.msra.mxu0 %v3492_v20  ;;  %v1712_v20 = vld [vmem:[#allocation3 + $0x7e8] sm:$0xff] }
 0x4ef   : > { %3497 = vmatprep.subr.bf16.mxu0 %v3496_v23  ;;  %v3584_v21 = vpack.c.bf16 %v1712_v20, %v1711_v19 }
 0x4f1   : > { %2906 = vmatmul.mubr.f32.vlgmr.msra.gmra.mrb[4].mxu0 %v1399_v27 }
 0x4f2   : > { %3499 = vmatpush3.bf16.msra.mxu0 %v3496_v23  ;;  %2940 = vmatprep.mubr.f32.mxu0 %v1586_v30  ;;  %v1714_v23 = vld [vmem:[#allocation3 + $0x7f8] sm:$0xff]  ;;  %v3596_v30 = vpack.c.bf16 %v1890_v29, %v1889_v28 }
 0x4f3   : > { %3501 = vmatprep.subr.bf16.mxu0 %v3500_v26  ;;  %v3588_v24 = vpack.c.bf16 %v1714_v23, %v1713_v22 }
 0x4f6   : > { %3503 = vmatpush3.bf16.msra.mxu0 %v3500_v26  ;;  %v1888_v26 = vld [vmem:[#allocation3 + $0x888] sm:$0xff] }
 0x4f7   : > { %3505 = vmatprep.subr.bf16.mxu0 %v3504_v31  ;;  %v3592_v27 = vpack.c.bf16 %v1888_v26, %v1887_v25 }
 0x4fa   : > { %3507 = vmatpush3.bf16.msra.mxu0 %v3504_v31 }
 0x4fb   : > { %3509 = vmatprep.subr.bf16.mxu0 %v3508_v34 }
 0x4fe   : > { %3511 = vmatpush3.bf16.msra.mxu0 %v3508_v34 }
 0x4ff   : > { %3513 = vmatprep.subr.bf16.mxu0 %v3512_v37 }
 0x502   : > { %3515 = vmatpush3.bf16.msra.mxu0 %v3512_v37  ;;  %v1894_v37 = vld [vmem:[#allocation3 + $0x8b8] sm:$0xff] }
 0x503   : > { %3517 = vmatprep.subr.bf16.mxu0 %v3516_v40  ;;  %v3604_v38 = vpack.c.bf16 %v1894_v37, %v1893_v36 }
 0x506   : > { %3519 = vmatpush3.bf16.msra.mxu0 %v3516_v40  ;;  %v1896_v40 = vld [vmem:[#allocation3 + $0x8c8] sm:$0xff] }
 0x507   : > { %3521 = vmatprep.subr.bf16.mxu0 %v3520_v45  ;;  %v3608_v41 = vpack.c.bf16 %v1896_v40, %v1895_v39 }
 0x50a   : > { %3523 = vmatpush3.bf16.msra.mxu0 %v3520_v45  ;;  %v1898_v45 = vld [vmem:[#allocation3 + $0x8d8] sm:$0xff] }
 0x50b   : > { %3525 = vmatprep.subr.bf16.mxu0 %v3524_v48  ;;  %v3612_v46 = vpack.c.bf16 %v1898_v45, %v1897_v44 }
 0x50e   : > { %3527 = vmatpush3.bf16.msra.mxu0 %v3524_v48  ;;  %v1900_v48 = vld [vmem:[#allocation3 + $0x8e8] sm:$0xff] }
 0x511   : > { %2941 = vmatmul.mubr.f32.vlgmr.msra.gmra.mrb[4].mxu0 %v1587_v0  ;;  %v3616_v0 = vpack.c.bf16 %v1900_v48, %v1899_v47 }
 0x5e4   : > { %v2942_v61 = vpop.f32.mrb[4].mxu0 }
 0x5e5   : > { %v1691_v62 = vadd.f32 %v2942_v61, %v2088_v60  ;;  %v1671_v63 = vpop.f32.mrb[5].mxu0 }
 0x5e6   : > { %v1690_v2 = vadd.f32 %v2088_v60, %v1671_v63 }
 0x5e7   : > { %v1693_v5 = vadd.f32 %v1691_v62, %v3886_v42  ;;  %v1707_v42 = vld [vmem:[#allocation3 + $0x7c0] sm:$0xff] }
 0x5e8   : > { %v1692_v6 = vadd.f32 %v1690_v2, %v3889_v43  ;;  %v3576_v43 = vpack.c.bf16 %v1708_v15, %v1707_v42 }
 0x5e9   : > { %1695 = vst [vmem:[#allocation2 + $0x9] sm:$0xff] %v1693_v5 }
 0x5ea   : > { %1694 = vst [vmem:[#allocation2 + $0x1] sm:$0xff] %v1692_v6  ;;  %2975 = vmatprep.mubr.f32.mxu1 %v1692_v6 }
 0x5eb   : > { %2976 = vmatmul.mubr.f32.vlgmr.msra.gmra.mrb[4].mxu1 %v1693_v5 }
 0x5ec   : > { %3563 = vmatpush3.bf16.msra.mxu1 %v3560_v59 }
 0x5ed   : > { %3565 = vmatprep.subr.bf16.mxu1 %v3564_v7 }
 0x5f0   : > { %3567 = vmatpush3.bf16.msra.mxu1 %v3564_v7  ;;  %v1885_v51 = vld [vmem:[#allocation2 + $0xa] sm:$0xff] }
 0x5f1   : > { %v1696_v13 = vld [vmem:[#allocation2] sm:$0xff]  ;;  %3569 = vmatprep.subr.bf16.mxu1 %v3568_v10  ;;  %v1697_v31 = vld [vmem:[#allocation2 + $0x8] sm:$0xff] }
 0x5f2   : > { %3010 = vmatprep.mubr.f32.mxu1 %v1696_v13  ;;  %v1884_v34 = vld [vmem:[#allocation2 + $0x2] sm:$0xff] }
 0x5f4   : > { %3571 = vmatpush3.bf16.msra.mxu1 %v3568_v10 }
 0x5f5   : > { %3573 = vmatprep.subr.bf16.mxu1 %v3572_v14 }
 0x5f8   : > { %3575 = vmatpush3.bf16.msra.mxu1 %v3572_v14 }
 0x5f9   : > { %3577 = vmatprep.subr.bf16.mxu1 %v3576_v43 }
 0x5fc   : > { %3579 = vmatpush3.bf16.msra.mxu1 %v3576_v43 }
 0x5fd   : > { %3581 = vmatprep.subr.bf16.mxu1 %v3580_v18 }
 0x600   : > { %3583 = vmatpush3.bf16.msra.mxu1 %v3580_v18 }
 0x601   : > { %3585 = vmatprep.subr.bf16.mxu1 %v3584_v21 }
 0x604   : > { %3587 = vmatpush3.bf16.msra.mxu1 %v3584_v21 }
 0x605   : > { %3589 = vmatprep.subr.bf16.mxu1 %v3588_v24 }
 0x608   : > { %3591 = vmatpush3.bf16.msra.mxu1 %v3588_v24 }
 0x609   : > { %3593 = vmatprep.subr.bf16.mxu1 %v3592_v27 }
 0x60b   : > { %3011 = vmatmul.mubr.f32.vlgmr.msra.gmra.mrb[4].mxu1 %v1697_v31 }
 0x60c   : > { %3595 = vmatpush3.bf16.msra.mxu1 %v3592_v27  ;;  %3045 = vmatprep.mubr.f32.mxu1 %v1884_v34 }
 0x60d   : > { %3597 = vmatprep.subr.bf16.mxu1 %v3596_v30 }
 0x610   : > { %3599 = vmatpush3.bf16.msra.mxu1 %v3596_v30 }
 0x611   : > { %3601 = vmatprep.subr.bf16.mxu1 %v3600_v35 }
 0x614   : > { %3603 = vmatpush3.bf16.msra.mxu1 %v3600_v35 }
 0x615   : > { %3605 = vmatprep.subr.bf16.mxu1 %v3604_v38 }
 0x618   : > { %3607 = vmatpush3.bf16.msra.mxu1 %v3604_v38 }
 0x619   : > { %3609 = vmatprep.subr.bf16.mxu1 %v3608_v41 }
 0x61c   : > { %3611 = vmatpush3.bf16.msra.mxu1 %v3608_v41 }
 0x61d   : > { %3613 = vmatprep.subr.bf16.mxu1 %v3612_v46 }
 0x620   : > { %3615 = vmatpush3.bf16.msra.mxu1 %v3612_v46 }
 0x621   : > { %3617 = vmatprep.subr.bf16.mxu1 %v3616_v0 }
 0x624   : > { %3619 = vmatpush3.bf16.msra.mxu1 %v3616_v0 }
 0x625   : > { %3621 = vmatprep.subr.bf16.mxu1 %v3620_v50 }
 0x628   : > { %3623 = vmatpush3.bf16.msra.mxu1 %v3620_v50 }
 0x62b   : > { %3046 = vmatmul.mubr.f32.vlgmr.msra.gmra.mrb[4].mxu1 %v1885_v51 }
 0x6fe   : > { %v3047_v53 = vpop.f32.mrb[4].mxu1 }
 0x6ff   : > { %v1989_v54 = vadd.f32 %v3047_v53, %v2089_v52  ;;  %v1969_v55 = vpop.f32.mrb[5].mxu1 }
 0x700   : > { %v1988_v56 = vadd.f32 %v2089_v52, %v1969_v55 }
 0x701   : > { %3682 = vtanh.f32 %v1989_v54 }
 0x702   : > { %3684 = vtanh.f32 %v1988_v56 }
 0x70b   : > { %v3683_v57 = vpop.eup %3682 }
 0x70c   : > { %v3685_v58 = vpop.eup %3684  ;;  %1993 = vst [vmem:[%s200_s25 + $0x8] sm:$0xff] %v3683_v57 }
 0x70d   : > { %1992 = vst [vmem:[%s200_s25] sm:$0xff] %v3685_v58 }
 0x70e PF: > { %s15_s12 = sadd.s32 1, %s3756_s12  }
 0x70f   : > { %p12_p5 = scmp.ge.s32.totalorder %s15_s12, 4  }
 0x711   :  { %14 = sbr.rel (!%p12_p5) target bundleno = 2 (0x2), region = 93 }
 0x718   :  { %2015 = vsyncpa [#allocation4], 1 }
 0x719   :  { %2017 = vsyncpa [#allocation4 + $0x1], 1 }
 0x71a   :  { %2018 = vsyncpa [#allocation6], 1 }

</bundles_post_ra>
